<compile_context>
chip_gen: v7x
topology: tpu7x:2x2x1
jax: 0.10.0
libtpu: 0.0.40
codegen_flags: <defaults>
</compile_context>

<pallas_src>
import jax
import jax.numpy as jnp
from jax import lax
from jax.experimental import pallas as pl
from jax.experimental.pallas import tpu as pltpu

# Model hyper-parameters (opt.*) — small, deterministic, chosen in-script.
D = 32    # opt.embed_dim
H = 32    # opt.hidden_dim
L = 16    # opt.max_len
J = 8     # opt.max_jump
A = 4     # aspect sequence length
V = 50    # vocab size of opt.embedding_matrix

TB = 256        # samples per grid step (MXU-height aligned for v6e/v7x)
WLANES = 256    # lane width of the packed weight slab (needs L*L for W2-exp)
IDROWS = 8      # ids rows: [x_id, A aspect ids, padding] -> 8 sublanes
KV = 64         # vocab padded up for the one-hot contraction (V=50 <= 64)

# Packed-weight-slab layout (row offsets; every segment starts 8-aligned).
EMB_OFF = 0                # emb.T          [D, V]   rows  0..31
W1A_OFF = EMB_OFF + D      # W1[:D].T       [H, D]   rows 32..63
W1B_OFF = W1A_OFF + H      # W1[D:].T       [H, D]   rows 64..95
B1_OFF = W1B_OFF + H       # b1 column      [H, 1]   rows 96..127
W2E_OFF = B1_OFF + H       # expanded W2.T  [L, L*L] rows 128..143
W3_OFF = W2E_OFF + L       # W3.T           [H, L]   rows 144..175
B2_OFF = W3_OFF + H        # b2 column      [H, 1]   rows 176..207
W4A_OFF = B2_OFF + H       # W4[:H].T       [J, H]   rows 208..215
W4B_OFF = W4A_OFF + J      # W4[H:].T       [J, H]   rows 216..223
ROWS = W4B_OFF + J         # 224 rows x 256 lanes f32 (~224 KiB, one DMA)


def pack_params(params):
    """Pack embedding + all weights (transposed) into one [ROWS, WLANES] f32 slab."""
    def seg(a, rows):
        a = jnp.asarray(a, jnp.float32)
        r, c = a.shape
        return jnp.pad(a, ((0, rows - r), (0, WLANES - c)))

    W1, W2, W3, W4 = params["W1"], params["W2"], params["W3"], params["W4"]
    # Expanded W2 so that (w2e.T @ adj_flat.T)[m, t] == sum_k W2[0,k] * adj[t,k,m]
    w2e = jnp.einsum("k,lm->klm", W2[0].astype(jnp.float32),
                     jnp.eye(L, dtype=jnp.float32)).reshape(L * L, L)     # [256, 16]
    return jnp.concatenate([
        seg(params["embedding"].T, D),          # [D, V]
        seg(W1[:D].T, H),                       # [H, D]
        seg(W1[D:].T, H),                       # [H, D]
        seg(params["b1"].reshape(H, 1), H),     # [H, 1]
        seg(w2e.T, L),                          # [L, L*L]
        seg(W3.T, H),                           # [H, L]
        seg(params["b2"].reshape(H, 1), H),     # [H, 1]
        seg(W4[:H].T, J),                       # [J, H]
        seg(W4[H:].T, J),                       # [J, H]
    ], axis=0)


def policy_kernel(w_ref, ids_ref, adj_ref, out_ref):
    # w_ref   : VMEM f32  [ROWS, 256]  packed transposed-weight slab
    # ids_ref : VMEM i32  [8,  TB]     row 0 = word id, rows 1..A = aspect ids
    # adj_ref : VMEM bf16 [L*L, TB]    adj[t].reshape(-1) along sublanes
    # out_ref : VMEM f32  [J, TB]      softmax(jump logits), samples on lanes
    f32 = jnp.float32

    # ---- embedding gathers via one-hot matmuls, vectorized over TB lanes ----
    vocab_iota = lax.broadcasted_iota(jnp.int32, (KV, TB), 0)            # [64, TB]
    x_sel = (vocab_iota == ids_ref[0:1, :]).astype(f32)                  # [64, TB]
    asp_sel = jnp.zeros((KV, TB), f32)
    cnt = jnp.zeros((1, TB), f32)
    for j in range(A):                              # A=4 static -> 4 vector compares
        aid = ids_ref[1 + j:2 + j, :]                                    # [1, TB]
        asp_sel = asp_sel + (vocab_iota == aid).astype(f32)
        cnt = cnt + (aid != 0).astype(f32)

    emb_t = w_ref[EMB_OFF:EMB_OFF + D, 0:KV]                             # [D, 64]
    x_emb = jnp.dot(emb_t, x_sel, preferred_element_type=f32)            # [D, TB]
    asp_sum = jnp.dot(emb_t, asp_sel, preferred_element_type=f32)        # [D, TB]
    # Matches the PyTorch module exactly: NaN/Inf if all aspect ids are padding.
    aspect = asp_sum / cnt                                               # [D, TB]

    # ---- x_out = relu(cat([aspect, x]) @ W1 + b1)  (split-K, no lane concat) ----
    x_out = jnp.dot(w_ref[W1A_OFF:W1A_OFF + H, 0:D], aspect,
                    preferred_element_type=f32)
    x_out = x_out + jnp.dot(w_ref[W1B_OFF:W1B_OFF + H, 0:D], x_emb,
                            preferred_element_type=f32)
    x_out = jnp.maximum(x_out + w_ref[B1_OFF:B1_OFF + H, 0:1], 0.0)      # [H, TB]

    # ---- adj_out = relu(relu(W2 @ adj) @ W3 + b2): one batched MXU dot ----
    adj1 = jnp.dot(w_ref[W2E_OFF:W2E_OFF + L, 0:L * L],
                   adj_ref[...].astype(f32), preferred_element_type=f32)
    adj1 = jnp.maximum(adj1, 0.0)                                        # [L, TB]
    adj_out = jnp.dot(w_ref[W3_OFF:W3_OFF + H, 0:L], adj1,
                      preferred_element_type=f32)
    adj_out = jnp.maximum(adj_out + w_ref[B2_OFF:B2_OFF + H, 0:1], 0.0)  # [H, TB]

    # ---- logits = cat([x_out, adj_out]) @ W4  (split-K) ----
    logits = jnp.dot(w_ref[W4A_OFF:W4A_OFF + J, 0:H], x_out,
                     preferred_element_type=f32)
    logits = logits + jnp.dot(w_ref[W4B_OFF:W4B_OFF + J, 0:H], adj_out,
                              preferred_element_type=f32)                # [J, TB]

    # ---- numerically stable softmax over the jump axis (sublanes) ----
    m = jnp.max(logits, axis=0, keepdims=True)
    e = jnp.exp(logits - m)
    out_ref[...] = e * pl.reciprocal(jnp.sum(e, axis=0, keepdims=True),
                                     approx=False)


def policy_forward(packed_weights, ids, adj, *, tb=TB):
    """packed_weights: [ROWS, WLANES] f32, ids: [B, 1+A] int32, adj: [B, L, L]."""
    B = ids.shape[0]
    nb = pl.cdiv(B, tb)
    Bp = nb * tb
    pad = Bp - B

    # Host-side layout plumbing: samples -> lane axis, adj flattened + bf16
    # (bf16 is exact for 0/1 adjacency; general float adjacency would round).
    ids_p = jnp.pad(ids.astype(jnp.int32),
                    ((0, pad), (0, IDROWS - ids.shape[1])))              # [Bp, 8]
    adj_p = jnp.pad(adj.astype(jnp.float32), ((0, pad), (0, 0), (0, 0)))
    ids_t = ids_p.T                                                      # [8, Bp]
    adj_t = adj_p.reshape(Bp, L * L).T.astype(jnp.bfloat16)              # [256, Bp]

    grid_spec = pl.GridSpec(
        grid=(nb,),
        in_specs=[
            pl.BlockSpec((ROWS, WLANES), lambda i: (0, 0)),   # weight slab (resident)
            pl.BlockSpec((IDROWS, tb), lambda i: (0, i)),     # ids, samples on lanes
            pl.BlockSpec((L * L, tb), lambda i: (0, i)),      # adj, samples on lanes
        ],
        out_specs=pl.BlockSpec((J, tb), lambda i: (0, i)),
    )
    out = pl.pallas_call(
        policy_kernel,
        out_shape=jax.ShapeDtypeStruct((J, Bp), jnp.float32),
        grid_spec=grid_spec,
        compiler_params=pltpu.CompilerParams(
            dimension_semantics=("parallel",)),
    )(packed_weights, ids_t, adj_t)
    return out[:, :B].T                                                  # [B, J]


def policy_reference(params, x_ids, adj, aspect_ids):
    """Pure-JAX transcription of the PyTorch forward, batched over samples."""
    emb = params["embedding"]
    x = emb[x_ids[:, 0]]                                                  # [B, D]
    aspect_len = jnp.sum(aspect_ids != 0, axis=-1, keepdims=True).astype(jnp.float32)
    aspect = jnp.sum(emb[aspect_ids], axis=1) / aspect_len                # [B, D]
    aspect_x = jnp.concatenate([aspect, x], axis=-1)                      # [B, 2D]
    x_out = jax.nn.relu(jnp.matmul(aspect_x, params["W1"]) + params["b1"])
    adj1 = jax.nn.relu(jnp.einsum("ok,bkl->bol", params["W2"], adj))[:, 0]  # [B, L]
    adj_out = jax.nn.relu(jnp.matmul(adj1, params["W3"]) + params["b2"])  # [B, H]
    out = jnp.matmul(jnp.concatenate([x_out, adj_out], axis=-1), params["W4"])
    return jax.nn.softmax(out, axis=-1)


if __name__ == "__main__":
    key = jax.random.PRNGKey(0)
    keys = jax.random.split(key, 10)

    params = {
        "embedding": jax.random.normal(keys[0], (V, D), jnp.float32),
        "W1": 0.1 * jax.random.normal(keys[1], (2 * D, H), jnp.float32),
        "b1": 0.1 * jax.random.normal(keys[2], (H,), jnp.float32),
        "W2": 0.1 * jax.random.normal(keys[3], (1, L), jnp.float32),
        "W3": 0.1 * jax.random.normal(keys[4], (L, H), jnp.float32),
        "b2": 0.1 * jax.random.normal(keys[5], (H,), jnp.float32),
        "W4": 0.1 * jax.random.normal(keys[6], (2 * H, J), jnp.float32),
    }
    packed = pack_params(params)          # one-time packing at param init

    # A batch of independent policy steps (each sample = the module's
    # single-sample forward): one word id, aspect ids (0 = padding), adjacency.
    B = 512                               # 2 grid blocks of TB=256
    x_ids = jax.random.randint(keys[7], (B, 1), 1, V, dtype=jnp.int32)
    aspect_ids = jax.random.randint(keys[8], (B, A), 0, V, dtype=jnp.int32)
    # Ensure at least one non-padding aspect id per sample (avoid the module's 0/0).
    aspect_ids = aspect_ids.at[:, 0].set(jnp.maximum(aspect_ids[:, 0], 1))
    adj = (jax.random.uniform(keys[9], (B, L, L)) < 0.3).astype(jnp.float32)
    ids = jnp.concatenate([x_ids, aspect_ids], axis=1).astype(jnp.int32)   # [B, 1+A]

    out = jax.block_until_ready(policy_forward(packed, ids, adj))

    with jax.default_matmul_precision("highest"):
        refs = policy_reference(params, x_ids, adj, aspect_ids)

    assert out.shape == (B, J), out.shape
    assert bool(jnp.allclose(jnp.sum(out, axis=-1), 1.0, atol=1e-5))
    assert bool(jnp.allclose(out, refs, atol=1e-5, rtol=1e-5)), \
        float(jnp.max(jnp.abs(out - refs)))
    print("KERNEL_OK")
</pallas_src>

<mosaic_0001>
module attributes {stable_mosaic.version = 11 : i64} {
  func.func @policy_kernel(%arg0: i32, %arg1: memref<224x256xf32, #tpu.memory_space<vmem>>, %arg2: memref<8x256xi32, #tpu.memory_space<vmem>>, %arg3: memref<256x256xbf16, #tpu.memory_space<vmem>>, %arg4: memref<8x256xf32, #tpu.memory_space<vmem>>) attributes {dimension_semantics = [#tpu.dimension_semantics<parallel>], iteration_bounds = array<i64: 2>, scalar_prefetch = 0 : i64, scratch_operands = 0 : i64, tpu.core_type = #tpu.core_type<tc>, window_params = [{pipeline_mode = #tpu.pipeline_mode<synchronous>, transform_indices = @transform_0, window_bounds = array<i64: 224, 256>}, {transform_indices = @transform_1, window_bounds = array<i64: 8, 256>}, {transform_indices = @transform_2, window_bounds = array<i64: 256, 256>}, {transform_indices = @transform_3, window_bounds = array<i64: 8, 256>}]} {
    %0 = tpu.iota {dimensions = array<i32: 0>} : vector<64x256xi32>
    %c0 = arith.constant 0 : index
    %c0_0 = arith.constant 0 : index
    %1 = vector.load %arg2[%c0, %c0_0] : memref<8x256xi32, #tpu.memory_space<vmem>>, vector<1x256xi32>
    %2 = vector.broadcast %1 : vector<1x256xi32> to vector<64x256xi32>
    %3 = arith.cmpi eq, %0, %2 : vector<64x256xi32>
    %4 = arith.extui %3 : vector<64x256xi1> to vector<64x256xi32>
    %5 = arith.sitofp %4 : vector<64x256xi32> to vector<64x256xf32>
    %cst = arith.constant 0.000000e+00 : f32
    %6 = vector.broadcast %cst : f32 to vector<64x256xf32>
    %cst_1 = arith.constant 0.000000e+00 : f32
    %7 = vector.broadcast %cst_1 : f32 to vector<1x256xf32>
    %c1 = arith.constant 1 : index
    %c0_2 = arith.constant 0 : index
    %8 = vector.load %arg2[%c1, %c0_2] : memref<8x256xi32, #tpu.memory_space<vmem>>, vector<1x256xi32>
    %9 = vector.broadcast %8 : vector<1x256xi32> to vector<64x256xi32>
    %10 = arith.cmpi eq, %0, %9 : vector<64x256xi32>
    %11 = arith.extui %10 : vector<64x256xi1> to vector<64x256xi32>
    %12 = arith.sitofp %11 : vector<64x256xi32> to vector<64x256xf32>
    %13 = arith.addf %6, %12 : vector<64x256xf32>
    %c0_i32 = arith.constant 0 : i32
    %14 = vector.broadcast %c0_i32 : i32 to vector<1x256xi32>
    %15 = arith.cmpi ne, %8, %14 : vector<1x256xi32>
    %16 = arith.extui %15 : vector<1x256xi1> to vector<1x256xi32>
    %17 = arith.sitofp %16 : vector<1x256xi32> to vector<1x256xf32>
    %18 = arith.addf %7, %17 : vector<1x256xf32>
    %c2 = arith.constant 2 : index
    %c0_3 = arith.constant 0 : index
    %19 = vector.load %arg2[%c2, %c0_3] : memref<8x256xi32, #tpu.memory_space<vmem>>, vector<1x256xi32>
    %20 = vector.broadcast %19 : vector<1x256xi32> to vector<64x256xi32>
    %21 = arith.cmpi eq, %0, %20 : vector<64x256xi32>
    %22 = arith.extui %21 : vector<64x256xi1> to vector<64x256xi32>
    %23 = arith.sitofp %22 : vector<64x256xi32> to vector<64x256xf32>
    %24 = arith.addf %13, %23 : vector<64x256xf32>
    %c0_i32_4 = arith.constant 0 : i32
    %25 = vector.broadcast %c0_i32_4 : i32 to vector<1x256xi32>
    %26 = arith.cmpi ne, %19, %25 : vector<1x256xi32>
    %27 = arith.extui %26 : vector<1x256xi1> to vector<1x256xi32>
    %28 = arith.sitofp %27 : vector<1x256xi32> to vector<1x256xf32>
    %29 = arith.addf %18, %28 : vector<1x256xf32>
    %c3 = arith.constant 3 : index
    %c0_5 = arith.constant 0 : index
    %30 = vector.load %arg2[%c3, %c0_5] : memref<8x256xi32, #tpu.memory_space<vmem>>, vector<1x256xi32>
    %31 = vector.broadcast %30 : vector<1x256xi32> to vector<64x256xi32>
    %32 = arith.cmpi eq, %0, %31 : vector<64x256xi32>
    %33 = arith.extui %32 : vector<64x256xi1> to vector<64x256xi32>
    %34 = arith.sitofp %33 : vector<64x256xi32> to vector<64x256xf32>
    %35 = arith.addf %24, %34 : vector<64x256xf32>
    %c0_i32_6 = arith.constant 0 : i32
    %36 = vector.broadcast %c0_i32_6 : i32 to vector<1x256xi32>
    %37 = arith.cmpi ne, %30, %36 : vector<1x256xi32>
    %38 = arith.extui %37 : vector<1x256xi1> to vector<1x256xi32>
    %39 = arith.sitofp %38 : vector<1x256xi32> to vector<1x256xf32>
    %40 = arith.addf %29, %39 : vector<1x256xf32>
    %c4 = arith.constant 4 : index
    %c0_7 = arith.constant 0 : index
    %41 = vector.load %arg2[%c4, %c0_7] : memref<8x256xi32, #tpu.memory_space<vmem>>, vector<1x256xi32>
    %42 = vector.broadcast %41 : vector<1x256xi32> to vector<64x256xi32>
    %43 = arith.cmpi eq, %0, %42 : vector<64x256xi32>
    %44 = arith.extui %43 : vector<64x256xi1> to vector<64x256xi32>
    %45 = arith.sitofp %44 : vector<64x256xi32> to vector<64x256xf32>
    %46 = arith.addf %35, %45 : vector<64x256xf32>
    %c0_i32_8 = arith.constant 0 : i32
    %47 = vector.broadcast %c0_i32_8 : i32 to vector<1x256xi32>
    %48 = arith.cmpi ne, %41, %47 : vector<1x256xi32>
    %49 = arith.extui %48 : vector<1x256xi1> to vector<1x256xi32>
    %50 = arith.sitofp %49 : vector<1x256xi32> to vector<1x256xf32>
    %51 = arith.addf %40, %50 : vector<1x256xf32>
    %c0_9 = arith.constant 0 : index
    %c0_10 = arith.constant 0 : index
    %52 = vector.load %arg1[%c0_9, %c0_10] : memref<224x256xf32, #tpu.memory_space<vmem>>, vector<32x64xf32>
    %cst_11 = arith.constant dense<0.000000e+00> : vector<32x256xf32>
    %53 = tpu.matmul %52, %5, %cst_11 {dimension_numbers = #tpu.dot_dimension_numbers<[1], [0], [0], [1], [0, 0, 1, 1], [], []>} : vector<32x64xf32>, vector<64x256xf32>, vector<32x256xf32> -> vector<32x256xf32>
    %cst_12 = arith.constant dense<0.000000e+00> : vector<32x256xf32>
    %54 = tpu.matmul %52, %46, %cst_12 {dimension_numbers = #tpu.dot_dimension_numbers<[1], [0], [0], [1], [0, 0, 1, 1], [], []>} : vector<32x64xf32>, vector<64x256xf32>, vector<32x256xf32> -> vector<32x256xf32>
    %55 = vector.broadcast %51 : vector<1x256xf32> to vector<32x256xf32>
    %56 = arith.divf %54, %55 : vector<32x256xf32>
    %c32 = arith.constant 32 : index
    %c0_13 = arith.constant 0 : index
    %57 = vector.load %arg1[%c32, %c0_13] : memref<224x256xf32, #tpu.memory_space<vmem>>, vector<32x32xf32>
    %cst_14 = arith.constant dense<0.000000e+00> : vector<32x256xf32>
    %58 = tpu.matmul %57, %56, %cst_14 {dimension_numbers = #tpu.dot_dimension_numbers<[1], [0], [0], [1], [0, 0, 1, 1], [], []>} : vector<32x32xf32>, vector<32x256xf32>, vector<32x256xf32> -> vector<32x256xf32>
    %c64 = arith.constant 64 : index
    %c0_15 = arith.constant 0 : index
    %59 = vector.load %arg1[%c64, %c0_15] : memref<224x256xf32, #tpu.memory_space<vmem>>, vector<32x32xf32>
    %cst_16 = arith.constant dense<0.000000e+00> : vector<32x256xf32>
    %60 = tpu.matmul %59, %53, %cst_16 {dimension_numbers = #tpu.dot_dimension_numbers<[1], [0], [0], [1], [0, 0, 1, 1], [], []>} : vector<32x32xf32>, vector<32x256xf32>, vector<32x256xf32> -> vector<32x256xf32>
    %61 = arith.addf %58, %60 : vector<32x256xf32>
    %c96 = arith.constant 96 : index
    %c0_17 = arith.constant 0 : index
    %62 = vector.load %arg1[%c96, %c0_17] : memref<224x256xf32, #tpu.memory_space<vmem>>, vector<32x1xf32>
    %63 = vector.broadcast %62 : vector<32x1xf32> to vector<32x256xf32>
    %64 = arith.addf %61, %63 : vector<32x256xf32>
    %cst_18 = arith.constant 0.000000e+00 : f32
    %65 = vector.broadcast %cst_18 : f32 to vector<32x256xf32>
    %66 = arith.maximumf %64, %65 : vector<32x256xf32>
    %c128 = arith.constant 128 : index
    %c0_19 = arith.constant 0 : index
    %67 = vector.load %arg1[%c128, %c0_19] : memref<224x256xf32, #tpu.memory_space<vmem>>, vector<16x256xf32>
    %c0_20 = arith.constant 0 : index
    %c0_21 = arith.constant 0 : index
    %68 = vector.load %arg3[%c0_20, %c0_21] : memref<256x256xbf16, #tpu.memory_space<vmem>>, vector<256x256xbf16>
    %69 = arith.extf %68 : vector<256x256xbf16> to vector<256x256xf32>
    %cst_22 = arith.constant dense<0.000000e+00> : vector<16x256xf32>
    %70 = tpu.matmul %67, %69, %cst_22 {dimension_numbers = #tpu.dot_dimension_numbers<[1], [0], [0], [1], [0, 0, 1, 1], [], []>} : vector<16x256xf32>, vector<256x256xf32>, vector<16x256xf32> -> vector<16x256xf32>
    %cst_23 = arith.constant 0.000000e+00 : f32
    %71 = vector.broadcast %cst_23 : f32 to vector<16x256xf32>
    %72 = arith.maximumf %70, %71 : vector<16x256xf32>
    %c144 = arith.constant 144 : index
    %c0_24 = arith.constant 0 : index
    %73 = vector.load %arg1[%c144, %c0_24] : memref<224x256xf32, #tpu.memory_space<vmem>>, vector<32x16xf32>
    %cst_25 = arith.constant dense<0.000000e+00> : vector<32x256xf32>
    %74 = tpu.matmul %73, %72, %cst_25 {dimension_numbers = #tpu.dot_dimension_numbers<[1], [0], [0], [1], [0, 0, 1, 1], [], []>} : vector<32x16xf32>, vector<16x256xf32>, vector<32x256xf32> -> vector<32x256xf32>
    %c176 = arith.constant 176 : index
    %c0_26 = arith.constant 0 : index
    %75 = vector.load %arg1[%c176, %c0_26] : memref<224x256xf32, #tpu.memory_space<vmem>>, vector<32x1xf32>
    %76 = vector.broadcast %75 : vector<32x1xf32> to vector<32x256xf32>
    %77 = arith.addf %74, %76 : vector<32x256xf32>
    %cst_27 = arith.constant 0.000000e+00 : f32
    %78 = vector.broadcast %cst_27 : f32 to vector<32x256xf32>
    %79 = arith.maximumf %77, %78 : vector<32x256xf32>
    %c208 = arith.constant 208 : index
    %c0_28 = arith.constant 0 : index
    %80 = vector.load %arg1[%c208, %c0_28] : memref<224x256xf32, #tpu.memory_space<vmem>>, vector<8x32xf32>
    %cst_29 = arith.constant dense<0.000000e+00> : vector<8x256xf32>
    %81 = tpu.matmul %80, %66, %cst_29 {dimension_numbers = #tpu.dot_dimension_numbers<[1], [0], [0], [1], [0, 0, 1, 1], [], []>} : vector<8x32xf32>, vector<32x256xf32>, vector<8x256xf32> -> vector<8x256xf32>
    %c216 = arith.constant 216 : index
    %c0_30 = arith.constant 0 : index
    %82 = vector.load %arg1[%c216, %c0_30] : memref<224x256xf32, #tpu.memory_space<vmem>>, vector<8x32xf32>
    %cst_31 = arith.constant dense<0.000000e+00> : vector<8x256xf32>
    %83 = tpu.matmul %82, %79, %cst_31 {dimension_numbers = #tpu.dot_dimension_numbers<[1], [0], [0], [1], [0, 0, 1, 1], [], []>} : vector<8x32xf32>, vector<32x256xf32>, vector<8x256xf32> -> vector<8x256xf32>
    %84 = arith.addf %81, %83 : vector<8x256xf32>
    %cst_32 = arith.constant dense<0xFF800000> : vector<256xf32>
    %85 = vector.multi_reduction <maximumf>, %84, %cst_32 [0] : vector<8x256xf32> to vector<256xf32>
    %86 = vector.shape_cast %85 : vector<256xf32> to vector<1x256xf32>
    %87 = vector.broadcast %86 : vector<1x256xf32> to vector<8x256xf32>
    %88 = arith.subf %84, %87 : vector<8x256xf32>
    %89 = math.exp %88 : vector<8x256xf32>
    %cst_33 = arith.constant dense<0.000000e+00> : vector<256xf32>
    %90 = vector.multi_reduction <add>, %89, %cst_33 [0] : vector<8x256xf32> to vector<256xf32>
    %91 = vector.shape_cast %90 : vector<256xf32> to vector<1x256xf32>
    %92 = tpu.reciprocal %91 : vector<1x256xf32> -> vector<1x256xf32>
    %93 = vector.broadcast %92 : vector<1x256xf32> to vector<8x256xf32>
    %94 = arith.mulf %89, %93 : vector<8x256xf32>
    %c0_34 = arith.constant 0 : index
    %c0_35 = arith.constant 0 : index
    %95 = vector.load %arg4[%c0_34, %c0_35] : memref<8x256xf32, #tpu.memory_space<vmem>>, vector<8x256xf32>
    tpu.vector_store %arg4[%c0_34, %c0_35], %94 {strides = array<i32>} : memref<8x256xf32, #tpu.memory_space<vmem>>, vector<8x256xf32>,
    return
  }
  func.func @transform_0(%arg0: i32) -> (i32, i32) {
    %c0_i32 = arith.constant 0 : i32
    %c0_i32_0 = arith.constant 0 : i32
    %c0_i32_1 = arith.constant 0 : i32
    return %c0_i32, %c0_i32_0 : i32, i32
  }
  func.func @transform_1(%arg0: i32) -> (i32, i32) {
    %c0_i32 = arith.constant 0 : i32
    %c0_i32_0 = arith.constant 0 : i32
    return %c0_i32, %arg0 : i32, i32
  }
  func.func @transform_2(%arg0: i32) -> (i32, i32) {
    %c0_i32 = arith.constant 0 : i32
    %c0_i32_0 = arith.constant 0 : i32
    return %c0_i32, %arg0 : i32, i32
  }
  func.func @transform_3(%arg0: i32) -> (i32, i32) {
    %c0_i32 = arith.constant 0 : i32
    %c0_i32_0 = arith.constant 0 : i32
    return %c0_i32, %arg0 : i32, i32
  }
}

</mosaic_0001>

<bundles_post_ra>
// kernel: tpu_custom_call.1
= control target key start
LH: loop header
LB: loop body
LE: loop exit
PB: predicated region body
PF: predicated region fallthrough
CT: control target
= control target key end

     0   :  { %8 = vsyncpa [#allocation3], 0  ;;  %s3021_s0 = inlined_call_operand.hbm [shape: f32[224,256], index: 0, kind: input, shape index: {}]   ;;  %s3022_s1 = inlined_call_operand.hbm [shape: s32[8,512], index: 1, kind: input, shape index: {}]   ;;  %s3023_s2 = inlined_call_operand.hbm [shape: bf16[256,512], index: 2, kind: input, shape index: {}]   ;;  %s3024_s3 = inlined_call_operand.hbm [shape: f32[8,512], index: 3, kind: output, shape index: {}]  }
   0x1   :  { %9 = vsyncpa [#allocation6], 0 }
   0x2   :  { %11 = vsyncpa [#allocation6 + $0x1], 0 }
   0x3   :  { %12 = vsyncpa [#allocation4], 0 }
   0x4   :  { %14 = vsyncpa [#allocation4 + $0x1], 0  ;;  %s2354_s12 = smov 0   ;;  %s2356_s13 = smov 0  }
   0x5   :  { %s2358_s14 = smov 0   ;;  %s2360_s15 = smov 0  }
   0x6 LB: > { %s2375_s16 = sadd.s32 1, %s2321_s15   ;;  %s48_s17 = sadd.s32 1, %s2317_s14  ;;  %s2321_s15 = sphi %s2360_s15, %s3045_s15   ;;  %s2317_s14 = sphi %s2358_s14, %s3044_s14   ;;  %s2313_s13 = sphi %s2356_s13, %s3043_s13   ;;  %s2309_s12 = sphi %s2354_s12, %s3042_s12  }
   0x7   : > { %s45_s18 = ssub.s32 %s2321_s15, %s2375_s16  ;;  %p55_p0 = scmp.ne.s32.totalorder %s2317_s14, %s2313_s13 }
   0x8   : > { %p46_p1 = scmp.eq.s32.totalorder %s45_s18, 0  ;;  %p56_p2 = scmp.eq.s32.totalorder %s2321_s15, 0 }
   0x9   : > { %p2058_p4 = scmp.lt.s32.totalorder %s2321_s15, 2  ;;  %s150_s20 = sand.u32 1, %s2321_s15  }
   0xa   : > { %s2386_s19 = scalar_select %p46_p1, %s2317_s14, %s48_s17  }
   0xb   : > { %p57_p5 = por %p56_p2, %p55_p0  ;;  %s152_s21 = sand.u32 1, %s2317_s14  }
   0xc   : > { %s1713_s22 = sshll.u32 %s152_s21, 4  ;;  %s1855_s23 = sshll.u32 %s2321_s15, 8 }
   0xd   : > { %s2397_s26 = scalar_lea.hbm %s3022_s1, %s1855_s23  ;;  %s154_s27 = scalar_lea.vmem [#allocation5], %s1713_s22 }
   0xe   : > { %s162_s28 = sshll.u32 %s154_s27, 4  ;;  %p2399_p6 = pnand %p2058_p4, %p57_p5  ;;  %s2403_s28 = int_to_ptr.vmem [resolvable:$true] %s162_s28 }
   0xf   : > { %s2405_s30 = sshll.u32 %s152_s21, 8  ;;  %s2407_s4 = scalar_lea.sflag [#allocation6], %s150_s20 }
  0x10   : > { %s2163_s5 = scalar_lea.hbm %s2397_s26, 256  ;;  %p2165_p8 = pneg %p2399_p6 }
  0x11   : > { %p2164_p7 = scmp.ne.s32.totalorder %s2397_s26, %s2163_s5  ;;  %s2168_s8 = scalar_lea.hbm %s3022_s1, 512 }
  0x12   : > { %p2169_p11 = scmp.lt.u32.totalorder %s2397_s26, %s3022_s1  ;;  %p2170_p12 = scmp.lt.u32.totalorder %s2168_s8, %s2163_s5 }
  0x13   : > { %p2166_p9 = pnand %p2165_p8, %p2164_p7  ;;  %p2172_p1 = scmp.lt.u32.totalorder %s2163_s5, %s2397_s26 }
  0x14   : > { %p2171_p13 = por %p2170_p12, %p2169_p11 }
  0x15   : > { %p2167_p10 = pneg %p2166_p9 }
  0x16   : > { %p2173_p2 = por %p2172_p1, %p2171_p13 }
  0x18   : > { %p2174_p4 = pnand %p2173_p2, %p2167_p10 }
  0x1a   : > { %2177 = shalt.err (!%p2174_p4)
}
  0x1b   : > { %s2178_s11 = scalar_lea.vmem %s2403_s28, 256  ;;  %s2323_s17 = smov [#allocation5]  }
  0x1c   : > { %p2179_p5 = scmp.ne.s32.totalorder %s2403_s28, %s2178_s11  ;;  %s2183_s18 = sshll.u32 %s2323_s17, 4  ;;  %s2184_s18 = int_to_ptr.vmem [resolvable:$false] %s2183_s18 }
  0x1d   : > { %s2185_s20 = scalar_lea.vmem %s2184_s18, 512  ;;  %p2186_p3 = scmp.lt.s32.totalorder %s2403_s28, %s2184_s18 }
  0x1e   : > { %p2181_p7 = pnand %p2179_p5, %p2165_p8  ;;  %p2187_p11 = scmp.lt.s32.totalorder %s2185_s20, %s2178_s11 }
  0x20   : > { %p2182_p9 = pneg %p2181_p7  ;;  %p2188_p12 = por %p2187_p11, %p2186_p3 }
  0x22   : > { %p2189_p13 = pnand %p2188_p12, %p2182_p9 }
  0x24   : > { %2192 = shalt.err (!%p2189_p13)
}
  0x25   : > { %2049 = dma.hbm_to_vmem [thread:$0]  (!%p2399_p6), %s2397_s26, 256, %s2403_s28, %s2407_s4  }
  0x26   : > { %s173_s21 = scalar_lea.vmem [#allocation7], %s2405_s30  ;;  %s2439_s23 = sadd.s32 4294967295, %s2321_s15  }
  0x27   : > { %s180_s22 = sshll.u32 %s173_s21, 4  ;;  %s1709_s24 = sadd.s32 4294967294, %s2321_s15   ;;  %s2436_s22 = int_to_ptr.vmem [resolvable:$true] %s180_s22 }
  0x28   : > { %p61_p3 = scmp.ne.s32.totalorder %s2313_s13, %s2309_s12  ;;  %p3025_p10 = scmp.eq.s32.totalorder %s2439_s23, 0 }
  0x29   : > { %p111_p1 = scmp.eq.s32.totalorder %s2439_s23, 1  ;;  %p117_p2 = scmp.eq.s32.totalorder %s1709_s24, 1 }
  0x2a   : > { %p2448_p4 = por %p3025_p10, %p61_p3  ;;  %p1710_p5 = scmp.ge.s32.totalorder %s2321_s15, 1 }
  0x2b   : > { %p2456_p7 = por %p111_p1, %p55_p0  ;;  %p2460_p9 = por %p117_p2, %p61_p3 }
  0x2c   : > { %s3030_s25 = scalar_select %p2448_p4, 1, 0 }
  0x2d   : > { %s3031_s26 = scalar_select %p2456_p7, 1, 0 }
  0x2e   : > { %s3032_s27 = scalar_select %p2460_p9, 1, 0 }
  0x2f   : > { %p124_p11 = scmp.lt.s32.totalorder %s2321_s15, 3  ;;  %s2324_s30 = smov [#allocation2]  }
  0x30   : > { %s136_s5 = sshll.u32 %s2324_s30, 4  ;;  %s1856_s6 = sshll.u32 %s2321_s15, 7  ;;  %s2469_s5 = int_to_ptr.vmem [resolvable:$true] %s136_s5 }
  0x31   : > { %p2465_p12 = pnand %p1710_p5, %p124_p11  ;;  %s2477_s9 = scalar_lea.hbm %s3023_s2, %s1856_s6 }
  0x32   : > { %s2193_s11 = scalar_lea.hbm %s2477_s9, 4096  ;;  %s2198_s20 = scalar_lea.hbm %s3023_s2, 8192 }
  0x33   : > { %s3033_s28 = scalar_select %p2465_p12, 1, 0 }
  0x34   : > { %p2042_p13 = pneg %p2465_p12  ;;  %p2194_p3 = scmp.ne.s32.totalorder %s2477_s9, %s2193_s11 }
  0x35   : > { %p2199_p5 = scmp.lt.u32.totalorder %s2477_s9, %s3023_s2  ;;  %p2200_p11 = scmp.lt.u32.totalorder %s2198_s20, %s2193_s11 }
  0x36   : > { %p2481_p0 = pnand %p2042_p13, %p3025_p10  ;;  %p2196_p1 = pnand %p2194_p3, %p2165_p8 }
  0x37   : > { %p2201_p9 = por %p2200_p11, %p2199_p5  ;;  %p2202_p13 = scmp.lt.u32.totalorder %s2193_s11, %s2477_s9 }
  0x38   : > { %p2197_p2 = pneg %p2196_p1 }
  0x39   : > { %p2203_p10 = por %p2202_p13, %p2201_p9 }
  0x3b   : > { %p2204_p7 = pnand %p2203_p10, %p2197_p2 }
  0x3d   : > { %2207 = shalt.err (!%p2204_p7)
}
  0x3e   : > { %s2208_s30 = scalar_lea.vmem %s2436_s22, 4096  ;;  %s2325_s6 = smov [#allocation7]  }
  0x3f   : > { %p2209_p3 = scmp.ne.s32.totalorder %s2436_s22, %s2208_s30  ;;  %s2213_s7 = sshll.u32 %s2325_s6, 4  ;;  %s2214_s7 = int_to_ptr.vmem [resolvable:$false] %s2213_s7 }
  0x40   : > { %s2215_s8 = scalar_lea.vmem %s2214_s7, 8192  ;;  %p2216_p12 = scmp.lt.s32.totalorder %s2436_s22, %s2214_s7 }
  0x41   : > { %p2211_p1 = pnand %p2209_p3, %p2165_p8  ;;  %p2217_p5 = scmp.lt.s32.totalorder %s2215_s8, %s2208_s30 }
  0x43   : > { %p2212_p4 = pneg %p2211_p1  ;;  %p2218_p11 = por %p2217_p5, %p2216_p12 }
  0x45   : > { %p2219_p9 = pnand %p2218_p11, %p2212_p4 }
  0x47   : > { %2222 = shalt.err (!%p2219_p9)
}
  0x48   : > { %s2326_s11 = smov 256   ;;  %s2327_s17 = smov 128  }
  0x49   : > { %s2328_s18 = smov 8   ;;  %s2223_s24 = scalar_lea.hbm %s3021_s0, 7168 }
  0x4a   : > { %2052 = dma.hbm_to_vmem [thread:$0]  (!%p2399_p6), %s2477_s9, 4096, %s2436_s22, %s2407_s4, %s2326_s11, %s2327_s17, %s2328_s18  }
  0x4b   : > { %p2224_p8 = scmp.ne.s32.totalorder %s3021_s0, %s2223_s24  ;;  %p2225_p10 = pneg %p2481_p0 }
  0x4c   : > { %p2230_p12 = scmp.lt.u32.totalorder %s2223_s24, %s3021_s0 }
  0x4d   : > { %p2226_p4 = pnand %p2225_p10, %p2224_p8 }
  0x4f   : > { %p2227_p7 = pneg %p2226_p4 }
  0x51   : > { %p2232_p2 = pnand %p2230_p12, %p2227_p7 }
  0x53   : > { %2235 = shalt.err (!%p2232_p2)
}
  0x54   : > { %s2236_s29 = scalar_lea.vmem %s2469_s5, 7168  ;;  %p2244_p1 = scmp.lt.s32.totalorder %s2469_s5, %s2469_s5 }
  0x55   : > { %p2237_p6 = scmp.ne.s32.totalorder %s2469_s5, %s2236_s29  ;;  %p2245_p5 = scmp.lt.s32.totalorder %s2236_s29, %s2236_s29 }
  0x57   : > { %p2239_p13 = pnand %p2237_p6, %p2225_p10  ;;  %p2246_p11 = por %p2245_p5, %p2244_p1 }
  0x59   : > { %p2240_p3 = pneg %p2239_p13 }
  0x5b   : > { %p2247_p9 = pnand %p2246_p11, %p2240_p3 }
  0x5d   : > { %2250 = shalt.err (!%p2247_p9)
}
  0x5e   : > { %s2329_s4 = smov 16   ;;  %p3035_p8 = scmp.ne.s32.totalorder %s3033_s28, 0 }
  0x5f   : > { %2045 = dma.hbm_to_vmem [thread:$0]  (!%p2481_p0), %s3021_s0, 7168, %s2469_s5, [#allocation3], %s2326_s11, %s2326_s11, %s2329_s4  }
  0x60   : > { %192 = sbr.rel (%p3035_p8) target bundleno = 989 (0x3dd), region = 32  ;;  %p3036_p10 = scmp.eq.s32.totalorder (!%p3035_p8), %s2439_s23, 0 }
  0x67   : > { %2296 = dma.done.wait (%p3036_p10), [#allocation3], 7168   ;;  %p3037_p4 = pmov %p3036_p10 }
  0x68   : > { %s198_s17 = sand.u32 1, %s2439_s23   ;;  %s2538_s18 = sand.u32 1, %s2313_s13  }
  0x69   : > { %2298 = vsyncadd (%p3037_p4), [#allocation3], 4294960128  ;;  %s1721_s10 = sshll.u32 %s2538_s18, 4  ;;  %s199_s20 = scalar_lea.sflag [#allocation6], %s198_s17 }
  0x6a   : > { %s2543_s5 = scalar_lea.vmem [#allocation5], %s1721_s10  ;;  %p3038_p0 = scmp.ne.s32.totalorder %s3030_s25, 0 }
  0x6c   : > { %2300 = dma.done.wait (%p3038_p0), %s199_s20, 4352  }
  0x6d   : > { %2302 = vsyncadd (%p3038_p0), %s199_s20, 4294962944  ;;  %v242_v0 = vlaneseq  ;;  %v2330_v1 = vmov 0.0   ;;  %s1722_s25 = sshll.u32 %s2538_s18, 8  ;;  %v251_v12 = vld [vmem:[%s2543_s5] ss:$8 sm:$0x3] }
  0x6e   : > { %701 = vmatprep.mubr.f32.mxu0 %v2330_v1  ;;  %790 = vmatprep.mubr.f32.mxu1 %v2330_v1  ;;  %v1740_v13 = vld [vmem:[%s2543_s5 + $0x1] ss:$8 sm:$0x3]  ;;  %v2593_v17 = vld [vmem:[%s2543_s5 + $0x2] ss:$8 sm:$0x3] }
  0x6f   : > { %v2551_v2 = vshrl.u32 %v242_v0, 7  ;;  %vm382_vm0 = vcmp.ne.s32.totalorder %v1740_v13, 0  ;;  %vm460_vm1 = vcmp.ne.s32.totalorder %v2593_v17, 0  ;;  %s2612_s28 = scalar_lea.vmem [#allocation7], %s1722_s25  ;;  %v2331_v22 = vmov 1.0|1.0  }
  0x70   : > { %v1757_v18 = vsel %vm382_vm0, 1.0, %v2330_v1  ;;  %v1776_v21 = vld [vmem:[%s2543_s5 + $0x3] ss:$8 sm:$0x3]  ;;  %v1775_v28 = vsel %vm460_vm1, 1.0, %v2330_v1  ;;  %s1857_s11 = sshll.u32 %s2439_s23, 8 }
  0x71   : > { %v2554_v3 = vsub.s32 1, %v2551_v2  ;;  %v2557_v4 = vsub.s32 0, %v2551_v2  ;;  %v2560_v5 = vadd.s32 8, %v2551_v2  ;;  %v2563_v6 = vadd.s32 16, %v2551_v2  ;;  %s238_s21 = scalar_lea.vmem [#allocation8], %s1721_s10  ;;  %s2977_s30 = scalar_lea.hbm %s3024_s3, %s1857_s11 }
  0x72   : > { %v2566_v7 = vadd.s32 24, %v2551_v2  ;;  %v2569_v8 = vadd.s32 32, %v2551_v2  ;;  %v2572_v9 = vadd.s32 40, %v2551_v2  ;;  %v2575_v10 = vadd.s32 48, %v2551_v2  ;;  %s1607_s24 = sshll.u32 %s238_s21, 4  ;;  %s1593_s23 = scalar_lea.sflag [#allocation4], %s2538_s18  ;;  %s2979_s24 = int_to_ptr.vmem [resolvable:$true] %s1607_s24 }
  0x73   : > { %v2578_v11 = vadd.s32 56, %v2551_v2  ;;  %v2584_v14 = vrot.slane %v251_v12, %v2554_v3  ;;  %v2587_v15 = vrot.slane %v251_v12, %v2557_v4  ;;  %v2590_v16 = vrot.slane %v1740_v13, %v2554_v3  ;;  %v1794_v25 = vld [vmem:[%s2543_s5 + $0x4] ss:$8 sm:$0x3]  ;;  %s2251_s8 = scalar_lea.vmem %s2979_s24, 256  ;;  %p3039_p12 = scmp.ne.s32.totalorder %s3031_s26, 0 }
  0x74   : > { %v2598_v19 = vrot.slane %v2593_v17, %v2554_v3  ;;  %v2602_v20 = vrot.slane %v1740_v13, %v2557_v4  ;;  %v2653_v29 = vrot.slane %v1776_v21, %v2554_v3  ;;  %v463_v32 = vadd.f32 %v1775_v28, %v1757_v18  ;;  %p2252_p7 = scmp.ne.s32.totalorder %s2979_s24, %s2251_s8  ;;  %s2333_s29 = smov [#allocation8]  }
  0x75   : > { %vm261_vm2 = vcmp.eq.s32.totalorder %v2551_v2, %v2584_v14  ;;  %vm263_vm3 = vcmp.eq.s32.totalorder %v2560_v5, %v2584_v14  ;;  %vm260_vm4 = vcmp.eq.s32.totalorder %v2551_v2, %v2587_v15  ;;  %vm262_vm5 = vcmp.eq.s32.totalorder %v2560_v5, %v2587_v15  ;;  %s2255_s4 = sshll.u32 %s2333_s29, 4  ;;  %s2256_s4 = int_to_ptr.vmem [resolvable:$false] %s2255_s4 }
  0x76   : > { %vm1858_vm6 = vmpackc.low %vm263_vm3, %vm261_vm2  ;;  %vm265_vm7 = vcmp.eq.s32.totalorder %v2563_v6, %v2584_v14  ;;  %vm267_vm8 = vcmp.eq.s32.totalorder %v2566_v7, %v2584_v14  ;;  %vm264_vm9 = vcmp.eq.s32.totalorder %v2563_v6, %v2587_v15  ;;  %vm266_vm10 = vcmp.eq.s32.totalorder %v2566_v7, %v2587_v15  ;;  %p2253_p2 = pnand %p2252_p7, %p3039_p12  ;;  %s2257_s22 = scalar_lea.vmem %s2256_s4, 512 }
  0x77   : > { %1859 = vmatprep.subr.msk.bf16.mxu0 %vm1858_vm6, %v2331_v22  ;;  %vm1860_vm11 = vmpackc.low %vm262_vm5, %vm260_vm4  ;;  %vm269_vm12 = vcmp.eq.s32.totalorder %v2569_v8, %v2584_v14  ;;  %vm271_vm13 = vcmp.eq.s32.totalorder %v2572_v9, %v2584_v14  ;;  %vm319_vm14 = vcmp.eq.s32.totalorder %v2551_v2, %v2590_v16  ;;  %vm321_vm15 = vcmp.eq.s32.totalorder %v2560_v5, %v2590_v16  ;;  %p2258_p13 = scmp.lt.s32.totalorder %s2979_s24, %s2256_s4  ;;  %p2259_p3 = scmp.lt.s32.totalorder %s2257_s22, %s2251_s8 }
  0x78   : > { %1861 = vmatpush1.bf16.msk.msra.mxu0 %vm1860_vm11, %v2331_v22  ;;  %vm1862_vm0 = vmpackc.low %vm267_vm8, %vm265_vm7  ;;  %v1742_v23 = vsel %vm319_vm14, 1.0, %v2330_v1  ;;  %v1744_v24 = vsel %vm321_vm15, 1.0, %v2330_v1  ;;  %vm397_vm2 = vcmp.eq.s32.totalorder %v2551_v2, %v2598_v19  ;;  %vm399_vm3 = vcmp.eq.s32.totalorder %v2560_v5, %v2598_v19  ;;  %p2254_p6 = pneg %p2253_p2 }
  0x79   : > { %1863 = vmatprep.subr.msk.bf16.mxu0 %vm1862_vm0, %v2331_v22  ;;  %vm1864_vm4 = vmpackc.low %vm266_vm10, %vm264_vm9  ;;  %v1760_v26 = vsel %vm397_vm2, 1.0, %v2330_v1  ;;  %v1762_v27 = vsel %vm399_vm3, 1.0, %v2330_v1  ;;  %vm538_vm6 = vcmp.ne.s32.totalorder %v1776_v21, 0  ;;  %vm475_vm7 = vcmp.eq.s32.totalorder %v2551_v2, %v2653_v29  ;;  %p2260_p1 = por %p2259_p3, %p2258_p13 }
  0x7a   : > { %vm1866_vm5 = vmpackc.low %vm271_vm13, %vm269_vm12  ;;  %v445_v30 = vadd.f32 %v1760_v26, %v1742_v23  ;;  %v447_v31 = vadd.f32 %v1762_v27, %v1744_v24  ;;  %vm477_vm1 = vcmp.eq.s32.totalorder %v2560_v5, %v2653_v29  ;;  %v1793_v33 = vsel %vm538_vm6, 1.0, %v2330_v1 }
  0x7b   : > { %v2667_v34 = vrot.slane %v1794_v25, %v2554_v3  ;;  %v1778_v35 = vsel %vm475_vm7, 1.0, %v2330_v1  ;;  %v1780_v36 = vsel %vm477_vm1, 1.0, %v2330_v1  ;;  %v541_v37 = vadd.f32 %v1793_v33, %v463_v32  ;;  %p2261_p5 = pnand %p2260_p1, %p2254_p6 }
  0x7c   : > { %1865 = vmatpush1.bf16.msk.msra.mxu0 %vm1864_vm4, %v2331_v22  ;;  %vm616_vm8 = vcmp.ne.s32.totalorder %v1794_v25, 0  ;;  %v523_v38 = vadd.f32 %v1778_v35, %v445_v30  ;;  %v525_v39 = vadd.f32 %v1780_v36, %v447_v31  ;;  %vm268_vm11 = vcmp.eq.s32.totalorder %v2569_v8, %v2587_v15  ;;  %v2774_v35 = vld [vmem:[#allocation2] sm:$0xff] }
  0x7d   : > { %1867 = vmatprep.subr.msk.bf16.mxu0 %vm1866_vm5, %v2331_v22  ;;  %vm553_vm9 = vcmp.eq.s32.totalorder %v2551_v2, %v2667_v34  ;;  %vm555_vm10 = vcmp.eq.s32.totalorder %v2560_v5, %v2667_v34  ;;  %v1811_v42 = vsel %vm616_vm8, 1.0, %v2330_v1  ;;  %vm270_vm12 = vcmp.eq.s32.totalorder %v2572_v9, %v2587_v15 }
  0x7e   : > { %v1796_v40 = vsel %vm553_vm9, 1.0, %v2330_v1  ;;  %v1798_v41 = vsel %vm555_vm10, 1.0, %v2330_v1  ;;  %v2682_v45 = vadd.f32 %v1811_v42, %v541_v37  ;;  %vm1868_vm13 = vmpackc.low %vm270_vm12, %vm268_vm11  ;;  %vm318_vm14 = vcmp.eq.s32.totalorder %v2551_v2, %v2602_v20 }
  0x7f   : > { %v601_v43 = vadd.f32 %v1796_v40, %v523_v38  ;;  %v603_v44 = vadd.f32 %v1798_v41, %v525_v39  ;;  %vm320_vm15 = vcmp.eq.s32.totalorder %v2560_v5, %v2602_v20  ;;  %v2692_v46 = vrot.slane %v2593_v17, %v2557_v4 }
  0x80   : > { %v2695_v47 = vrot.slane %v1776_v21, %v2557_v4  ;;  %v819_v49 = vrot.slane %v2682_v45, %v2557_v4  ;;  %v823_v50 = vrot.slane %v2682_v45, %v2554_v3  ;;  %1869 = vmatpush1.bf16.msk.msra.mxu0 %vm1868_vm13, %v2331_v22  ;;  %v1741_v51 = vsel %vm318_vm14, 1.0, %v2330_v1 }
  0x81   : > { %v1874_v48 = vpack.c.bf16 %v603_v44, %v601_v43  ;;  %v1743_v52 = vsel %vm320_vm15, 1.0, %v2330_v1  ;;  %vm396_vm0 = vcmp.eq.s32.totalorder %v2551_v2, %v2692_v46  ;;  %vm398_vm2 = vcmp.eq.s32.totalorder %v2560_v5, %v2692_v46 }
  0x82   : > { %vm474_vm3 = vcmp.eq.s32.totalorder %v2551_v2, %v2695_v47  ;;  %v1759_v53 = vsel %vm396_vm0, 1.0, %v2330_v1  ;;  %v1761_v54 = vsel %vm398_vm2, 1.0, %v2330_v1  ;;  %vm476_vm4 = vcmp.eq.s32.totalorder %v2560_v5, %v2695_v47 }
  0x83   : > { %1875 = vmatprep.subr.bf16.mxu1 %v1874_v48  ;;  %v1777_v55 = vsel %vm474_vm3, 1.0, %v2330_v1  ;;  %v444_v56 = vadd.f32 %v1759_v53, %v1741_v51  ;;  %v446_v57 = vadd.f32 %v1761_v54, %v1743_v52  ;;  %v1779_v58 = vsel %vm476_vm4, 1.0, %v2330_v1 }
  0x84   : > { %v2717_v59 = vrot.slane %v1794_v25, %v2557_v4  ;;  %vm273_vm5 = vcmp.eq.s32.totalorder %v2575_v10, %v2584_v14  ;;  %vm275_vm6 = vcmp.eq.s32.totalorder %v2578_v11, %v2584_v14  ;;  %vm323_vm7 = vcmp.eq.s32.totalorder %v2563_v6, %v2590_v16  ;;  %v843_v4 = vld [vmem:[#allocation2 + $0xb0] sm:$0xff] }
  0x85   : > { %vm325_vm1 = vcmp.eq.s32.totalorder %v2566_v7, %v2590_v16  ;;  %v522_v60 = vadd.f32 %v1777_v55, %v444_v56  ;;  %v524_v61 = vadd.f32 %v1779_v58, %v446_v57  ;;  %vm1870_vm10 = vmpackc.low %vm275_vm6, %vm273_vm5  ;;  %v1746_v0 = vsel %vm323_vm7, 1.0, %v2330_v1 }
  0x86   : > { %vm552_vm8 = vcmp.eq.s32.totalorder %v2551_v2, %v2717_v59  ;;  %vm554_vm9 = vcmp.eq.s32.totalorder %v2560_v5, %v2717_v59  ;;  %1871 = vmatprep.subr.msk.bf16.mxu0 %vm1870_vm10, %v2331_v22  ;;  %v1748_v12 = vsel %vm325_vm1, 1.0, %v2330_v1  ;;  %vm624_vm11 = vcmask 523264  }
  0x87   : > { %v1795_v62 = vsel %vm552_vm8, 1.0, %v2330_v1  ;;  %v1797_v63 = vsel %vm554_vm9, 1.0, %v2330_v1  ;;  %vm401_vm12 = vcmp.eq.s32.totalorder %v2563_v6, %v2598_v19  ;;  %vm403_vm13 = vcmp.eq.s32.totalorder %v2566_v7, %v2598_v19 }
  0x88   : > { %v600_v13 = vadd.f32 %v1795_v62, %v522_v60  ;;  %v602_v14 = vadd.f32 %v1797_v63, %v524_v61  ;;  %v1764_v2 = vsel %vm401_vm12, 1.0, %v2330_v1  ;;  %v1766_v5 = vsel %vm403_vm13, 1.0, %v2330_v1  ;;  %v2815_v62 = vld [vmem:[#allocation2 + $0x20] sm:$0xff] }
  0x89   : > { %vm479_vm14 = vcmp.eq.s32.totalorder %v2563_v6, %v2653_v29  ;;  %vm481_vm15 = vcmp.eq.s32.totalorder %v2566_v7, %v2653_v29  ;;  %v449_v18 = vadd.f32 %v1764_v2, %v1746_v0  ;;  %v451_v21 = vadd.f32 %v1766_v5, %v1748_v12 }
  0x8a   : > { %v1876_v17 = vpack.c.bf16 %v602_v14, %v600_v13  ;;  %v1782_v23 = vsel %vm479_vm14, 1.0, %v2330_v1  ;;  %v1784_v24 = vsel %vm481_vm15, 1.0, %v2330_v1  ;;  %vm557_vm0 = vcmp.eq.s32.totalorder %v2563_v6, %v2667_v34 }
  0x8b   : > { %vm559_vm2 = vcmp.eq.s32.totalorder %v2566_v7, %v2667_v34  ;;  %vm272_vm3 = vcmp.eq.s32.totalorder %v2575_v10, %v2587_v15  ;;  %v527_v25 = vadd.f32 %v1782_v23, %v449_v18  ;;  %v529_v26 = vadd.f32 %v1784_v24, %v451_v21  ;;  %v2838_v23 = vld [vmem:[#allocation2 + $0x30] sm:$0xff] }
  0x8c   : > { %1877 = vmatpush1.bf16.msra.mxu1 %v1876_v17  ;;  %v1800_v27 = vsel %vm557_vm0, 1.0, %v2330_v1  ;;  %v1802_v28 = vsel %vm559_vm2, 1.0, %v2330_v1  ;;  %vm274_vm4 = vcmp.eq.s32.totalorder %v2578_v11, %v2587_v15  ;;  %vm322_vm5 = vcmp.eq.s32.totalorder %v2563_v6, %v2602_v20 }
  0x8d   : > { %vm324_vm6 = vcmp.eq.s32.totalorder %v2566_v7, %v2602_v20  ;;  %vm400_vm7 = vcmp.eq.s32.totalorder %v2563_v6, %v2692_v46  ;;  %v605_v30 = vadd.f32 %v1800_v27, %v527_v25  ;;  %v607_v31 = vadd.f32 %v1802_v28, %v529_v26  ;;  %vm1872_vm1 = vmpackc.low %vm274_vm4, %vm272_vm3 }
  0x8e   : > { %v1745_v32 = vsel %vm322_vm5, 1.0, %v2330_v1  ;;  %v1747_v33 = vsel %vm324_vm6, 1.0, %v2330_v1  ;;  %1873 = vmatpush1.bf16.msk.msra.mxu0 %vm1872_vm1, %v2331_v22  ;;  %vm402_vm8 = vcmp.eq.s32.totalorder %v2566_v7, %v2692_v46  ;;  %v1763_v15 = vsel %vm400_vm7, 1.0, %v2330_v1 }
  0x8f   : > { %vm478_vm9 = vcmp.eq.s32.totalorder %v2563_v6, %v2695_v47  ;;  %vm480_vm10 = vcmp.eq.s32.totalorder %v2566_v7, %v2695_v47  ;;  %v1878_v36 = vpack.c.bf16 %v607_v31, %v605_v30  ;;  %v1765_v37 = vsel %vm402_vm8, 1.0, %v2330_v1 }
  0x90   : > { %v448_v38 = vadd.f32 %v1763_v15, %v1745_v32  ;;  %v1781_v39 = vsel %vm478_vm9, 1.0, %v2330_v1  ;;  %v450_v22 = vadd.f32 %v1765_v37, %v1747_v33  ;;  %v1783_v40 = vsel %vm480_vm10, 1.0, %v2330_v1 }
  0x91   : > { %vm556_vm12 = vcmp.eq.s32.totalorder %v2563_v6, %v2717_v59  ;;  %vm558_vm13 = vcmp.eq.s32.totalorder %v2566_v7, %v2717_v59  ;;  %1879 = vmatprep.subr.bf16.mxu1 %v1878_v36  ;;  %1828 = vmatmul.mubr.msk.f32.vlgmr.msra.gmra.mrb[0].mxu0 %vm624_vm11, %v2774_v35  ;;  %vm327_vm14 = vcmp.eq.s32.totalorder %v2569_v8, %v2590_v16  ;;  %v2795_v7 = vld [vmem:[#allocation2 + $0x10] sm:$0xff]  ;;  %2151 = vrcp.f32 %v819_v49 }
  0x92   : > { %v526_v41 = vadd.f32 %v1781_v39, %v448_v38  ;;  %v1799_v42 = vsel %vm556_vm12, 1.0, %v2330_v1  ;;  %v1801_v43 = vsel %vm558_vm13, 1.0, %v2330_v1  ;;  %v528_v44 = vadd.f32 %v1783_v40, %v450_v22  ;;  %707 = vmatprep.mubr.f32.mxu0 %v2330_v1 }
  0x93   : > { %vm329_vm15 = vcmp.eq.s32.totalorder %v2572_v9, %v2590_v16  ;;  %v1750_v6 = vsel %vm327_vm14, 1.0, %v2330_v1  ;;  %vm405_vm0 = vcmp.eq.s32.totalorder %v2569_v8, %v2598_v19  ;;  %vm407_vm2 = vcmp.eq.s32.totalorder %v2572_v9, %v2598_v19 }
  0x94   : > { %v604_v48 = vadd.f32 %v1799_v42, %v526_v41  ;;  %v1752_v51 = vsel %vm329_vm15, 1.0, %v2330_v1  ;;  %v1768_v52 = vsel %vm405_vm0, 1.0, %v2330_v1  ;;  %v606_v53 = vadd.f32 %v1801_v43, %v528_v44 }
  0x95   : > { %v1770_v54 = vsel %vm407_vm2, 1.0, %v2330_v1  ;;  %v453_v55 = vadd.f32 %v1768_v52, %v1750_v6  ;;  %vm483_vm3 = vcmp.eq.s32.totalorder %v2569_v8, %v2653_v29  ;;  %vm485_vm4 = vcmp.eq.s32.totalorder %v2572_v9, %v2653_v29  ;;  %1829 = vmatmul.mubr.msk.f32.gmra.mrb[2].mxu0 %vm624_vm11, %v2795_v7 }
  0x96   : > { %v455_v56 = vadd.f32 %v1770_v54, %v1752_v51  ;;  %v1786_v57 = vsel %vm483_vm3, 1.0, %v2330_v1  ;;  %vm561_vm5 = vcmp.eq.s32.totalorder %v2569_v8, %v2667_v34  ;;  %v1880_v58 = vpack.c.bf16 %v606_v53, %v604_v48  ;;  %713 = vmatprep.mubr.f32.mxu0 %v2330_v1 }
  0x97   : > { %v1788_v60 = vsel %vm485_vm4, 1.0, %v2330_v1  ;;  %v531_v61 = vadd.f32 %v1786_v57, %v453_v55  ;;  %vm563_vm6 = vcmp.eq.s32.totalorder %v2572_v9, %v2667_v34  ;;  %v1804_v0 = vsel %vm561_vm5, 1.0, %v2330_v1 }
  0x98   : > { %v533_v63 = vadd.f32 %v1788_v60, %v455_v56  ;;  %v1806_v12 = vsel %vm563_vm6, 1.0, %v2330_v1  ;;  %vm326_vm7 = vcmp.eq.s32.totalorder %v2569_v8, %v2602_v20  ;;  %1881 = vmatpush1.bf16.msra.mxu1 %v1880_v58  ;;  %vm328_vm1 = vcmp.eq.s32.totalorder %v2572_v9, %v2602_v20 }
  0x99   : > { %v609_v13 = vadd.f32 %v1804_v0, %v531_v61  ;;  %v1749_v14 = vsel %vm326_vm7, 1.0, %v2330_v1  ;;  %vm404_vm8 = vcmp.eq.s32.totalorder %v2569_v8, %v2692_v46  ;;  %v1751_v5 = vsel %vm328_vm1, 1.0, %v2330_v1  ;;  %1830 = vmatmul.mubr.msk.f32.gmra.mrb[4].mxu0 %vm624_vm11, %v2815_v62  ;;  %v2103_v61 = vld [vmem:[%s2612_s28 + $0x4] ss:$8 sps:$4 sm:$0xff]  }
  0x9a   : > { %v611_v2 = vadd.f32 %v1806_v12, %v533_v63  ;;  %vm406_vm9 = vcmp.eq.s32.totalorder %v2572_v9, %v2692_v46  ;;  %v1767_v17 = vsel %vm404_vm8, 1.0, %v2330_v1  ;;  %vm482_vm10 = vcmp.eq.s32.totalorder %v2569_v8, %v2695_v47  ;;  %719 = vmatprep.mubr.f32.mxu0 %v2330_v1  ;;  %v2109_v0 = vld [vmem:[%s2612_s28 + $0x24] ss:$8 sps:$4 sm:$0xff]   ;;  %v2111_v12 = vld [vmem:[%s2612_s28 + $0x20] ss:$8 sps:$4 sm:$0xff]  }
  0x9b   : > { %v1769_v18 = vsel %vm406_vm9, 1.0, %v2330_v1  ;;  %v452_v21 = vadd.f32 %v1767_v17, %v1749_v14  ;;  %vm484_vm12 = vcmp.eq.s32.totalorder %v2572_v9, %v2695_v47  ;;  %v1785_v26 = vsel %vm482_vm10, 1.0, %v2330_v1  ;;  %v1088_v14 = vld [vmem:[#allocation2 + $0x108] sm:$0xff]  ;;  %v2152_v49 = vpop.eup %2151 }
  0x9c   : > { %v1882_v24 = vpack.c.bf16 %v611_v2, %v609_v13  ;;  %v454_v25 = vadd.f32 %v1769_v18, %v1751_v5  ;;  %v1787_v27 = vsel %vm484_vm12, 1.0, %v2330_v1  ;;  %vm560_vm13 = vcmp.eq.s32.totalorder %v2569_v8, %v2717_v59  ;;  %v2112_v13 = vld [vmem:[%s2612_s28 + $0x34] ss:$8 sps:$4 sm:$0xff]   ;;  %v2117_v2 = vld [vmem:[%s2612_s28 + $0x40] ss:$8 sps:$4 sm:$0xff]  }
  0x9d   : > { %v530_v28 = vadd.f32 %v1785_v26, %v452_v21  ;;  %vm562_vm14 = vcmp.eq.s32.totalorder %v2572_v9, %v2717_v59  ;;  %vm331_vm15 = vcmp.eq.s32.totalorder %v2575_v10, %v2590_v16  ;;  %v1803_v31 = vsel %vm560_vm13, 1.0, %v2330_v1  ;;  %1831 = vmatmul.mubr.msk.f32.gmra.mrb[6].mxu0 %vm624_vm11, %v2838_v23  ;;  %v2120_v5 = vld [vmem:[%s2612_s28 + $0x50] ss:$8 sps:$4 sm:$0xff]   ;;  %v2121_v17 = vld [vmem:[%s2612_s28 + $0x64] ss:$8 sps:$4 sm:$0xff]  }
  0x9e   : > { %1883 = vmatprep.subr.bf16.mxu1 %v1882_v24  ;;  %v532_v30 = vadd.f32 %v1787_v27, %v454_v25  ;;  %v1805_v32 = vsel %vm562_vm14, 1.0, %v2330_v1  ;;  %vm333_vm0 = vcmp.eq.s32.totalorder %v2578_v11, %v2590_v16  ;;  %v1754_v8 = vsel %vm331_vm15, 1.0, %v2330_v1  ;;  %921 = vmatprep.mubr.f32.mxu0 %v2330_v1  ;;  %v2123_v18 = vld [vmem:[%s2612_s28 + $0x60] ss:$8 sps:$4 sm:$0xff]   ;;  %v2124_v21 = vld [vmem:[%s2612_s28 + $0x74] ss:$8 sps:$4 sm:$0xff]  }
  0x9f   : > { %v608_v33 = vadd.f32 %v1803_v31, %v530_v28  ;;  %v1756_v9 = vsel %vm333_vm0, 1.0, %v2330_v1  ;;  %vm409_vm2 = vcmp.eq.s32.totalorder %v2575_v10, %v2598_v19  ;;  %vm411_vm3 = vcmp.eq.s32.totalorder %v2578_v11, %v2598_v19  ;;  %v2127_v24 = vld [vmem:[%s2612_s28 + $0x84] ss:$8 sps:$4 sm:$0xff]   ;;  %v2129_v25 = vld [vmem:[%s2612_s28 + $0x80] ss:$8 sps:$4 sm:$0xff]  }
  0xa0   : > { %v610_v15 = vadd.f32 %v1805_v32, %v532_v30  ;;  %v1772_v36 = vsel %vm409_vm2, 1.0, %v2330_v1  ;;  %vm487_vm4 = vcmp.eq.s32.totalorder %v2575_v10, %v2653_v29  ;;  %v1774_v16 = vsel %vm411_vm3, 1.0, %v2330_v1  ;;  %v2130_v26 = vld [vmem:[%s2612_s28 + $0x94] ss:$8 sps:$4 sm:$0xff]   ;;  %v2132_v27 = vld [vmem:[%s2612_s28 + $0x90] ss:$8 sps:$4 sm:$0xff]  }
  0xa1   : > { %v457_v37 = vadd.f32 %v1772_v36, %v1754_v8  ;;  %vm489_vm5 = vcmp.eq.s32.totalorder %v2578_v11, %v2653_v29  ;;  %v1790_v38 = vsel %vm487_vm4, 1.0, %v2330_v1  ;;  %v459_v22 = vadd.f32 %v1774_v16, %v1756_v9  ;;  %v2133_v28 = vld [vmem:[%s2612_s28 + $0xa4] ss:$8 sps:$4 sm:$0xff]   ;;  %v2135_v30 = vld [vmem:[%s2612_s28 + $0xa0] ss:$8 sps:$4 sm:$0xff]  }
  0xa2   : > { %v1884_v39 = vpack.c.bf16 %v610_v15, %v608_v33  ;;  %v1792_v40 = vsel %vm489_vm5, 1.0, %v2330_v1  ;;  %vm565_vm6 = vcmp.eq.s32.totalorder %v2575_v10, %v2667_v34  ;;  %vm567_vm7 = vcmp.eq.s32.totalorder %v2578_v11, %v2667_v34  ;;  %v2136_v31 = vld [vmem:[%s2612_s28 + $0xb4] ss:$8 sps:$4 sm:$0xff]   ;;  %v2138_v32 = vld [vmem:[%s2612_s28 + $0xb0] ss:$8 sps:$4 sm:$0xff]  }
  0xa3   : > { %v535_v19 = vadd.f32 %v1790_v38, %v457_v37  ;;  %v1808_v41 = vsel %vm565_vm6, 1.0, %v2330_v1  ;;  %vm330_vm1 = vcmp.eq.s32.totalorder %v2575_v10, %v2602_v20  ;;  %v537_v29 = vadd.f32 %v1792_v40, %v459_v22  ;;  %v2139_v33 = vld [vmem:[%s2612_s28 + $0xc4] ss:$8 sps:$4 sm:$0xff]   ;;  %v2141_v8 = vld [vmem:[%s2612_s28 + $0xc0] ss:$8 sps:$4 sm:$0xff]   ;;  %v1090_v22 = vld [vmem:[#allocation2 + $0x118] sm:$0xff] }
  0xa4   : > { %1885 = vmatpush1.bf16.msra.mxu1 %v1884_v39  ;;  %v1810_v42 = vsel %vm567_vm7, 1.0, %v2330_v1  ;;  %vm332_vm8 = vcmp.eq.s32.totalorder %v2578_v11, %v2602_v20  ;;  %v1753_v43 = vsel %vm330_vm1, 1.0, %v2330_v1  ;;  %vm408_vm9 = vcmp.eq.s32.totalorder %v2575_v10, %v2692_v46  ;;  %v2142_v9 = vld [vmem:[%s2612_s28 + $0xd4] ss:$8 sps:$4 sm:$0xff]   ;;  %v2144_v15 = vld [vmem:[%s2612_s28 + $0xd0] ss:$8 sps:$4 sm:$0xff]  }
  0xa5   : > { %v613_v44 = vadd.f32 %v1808_v41, %v535_v19  ;;  %v1755_v6 = vsel %vm332_vm8, 1.0, %v2330_v1  ;;  %vm410_vm10 = vcmp.eq.s32.totalorder %v2578_v11, %v2692_v46  ;;  %v615_v34 = vadd.f32 %v1810_v42, %v537_v29  ;;  %v2145_v36 = vld [vmem:[%s2612_s28 + $0xe4] ss:$8 sps:$4 sm:$0xff]   ;;  %v2147_v16 = vld [vmem:[%s2612_s28 + $0xe0] ss:$8 sps:$4 sm:$0xff]   ;;  %v1089_v40 = vld [vmem:[#allocation2 + $0x110] sm:$0xff] }
  0xa6   : > { %v1771_v48 = vsel %vm408_vm9, 1.0, %v2330_v1  ;;  %v1773_v51 = vsel %vm410_vm10, 1.0, %v2330_v1  ;;  %vm486_vm12 = vcmp.eq.s32.totalorder %v2575_v10, %v2695_v47  ;;  %vm488_vm13 = vcmp.eq.s32.totalorder %v2578_v11, %v2695_v47  ;;  %v2148_v37 = vld [vmem:[%s2612_s28 + $0xf4] ss:$8 sps:$4 sm:$0xff]   ;;  %v2150_v38 = vld [vmem:[%s2612_s28 + $0xf0] ss:$8 sps:$4 sm:$0xff]  }
  0xa7   : > { %v456_v20 = vadd.f32 %v1771_v48, %v1753_v43  ;;  %v458_v52 = vadd.f32 %v1773_v51, %v1755_v6  ;;  %v1789_v53 = vsel %vm486_vm12, 1.0, %v2330_v1  ;;  %v1886_v54 = vpack.c.bf16 %v615_v34, %v613_v44  ;;  %v1087_v39 = vld [vmem:[#allocation2 + $0x100] sm:$0xff]  ;;  %v1275_v42 = vld [vmem:[#allocation2 + $0x190] sm:$0xff] }
  0xa8   : > { %v1791_v46 = vsel %vm488_vm13, 1.0, %v2330_v1  ;;  %vm564_vm14 = vcmp.eq.s32.totalorder %v2575_v10, %v2717_v59  ;;  %vm566_vm15 = vcmp.eq.s32.totalorder %v2578_v11, %v2717_v59  ;;  %v2105_v10 = vld [vmem:[%s2612_s28] ss:$8 sps:$4 sm:$0xff]   ;;  %v2106_v11 = vld [vmem:[%s2612_s28 + $0x14] ss:$8 sps:$4 sm:$0xff]   ;;  %v2332_v29 = vmov 0  }
  0xa9   : > { %v534_v55 = vadd.f32 %v1789_v53, %v456_v20  ;;  %v536_v56 = vadd.f32 %v1791_v46, %v458_v52  ;;  %v1807_v57 = vsel %vm564_vm14, 1.0, %v2330_v1  ;;  %v1809_v47 = vsel %vm566_vm15, 1.0, %v2330_v1  ;;  %1887 = vmatprep.subr.bf16.mxu1 %v1886_v54  ;;  %v2108_v59 = vld [vmem:[%s2612_s28 + $0x10] ss:$8 sps:$4 sm:$0xff]   ;;  %v1274_v19 = vld [vmem:[#allocation2 + $0x180] sm:$0xff]  ;;  %2102 = vset.pattern.permute.xlu1 %v2332_v29 }
  0xaa   : > { %v1272_v41 = vld [vmem:[#allocation2 + $0x160] sm:$0xff]  ;;  %2101 = vset.pattern.permute.xlu0 %v2332_v29  ;;  %1288 = vperm.xlu1 %2102, %v1274_v19   ;;  %v1273_v43 = vld [vmem:[#allocation2 + $0x170] sm:$0xff]  ;;  %2153 = vrcp.f32 %v823_v50  ;;  %vm1296_vm0 = vcmask 130048  }
  0xab   : > { %v612_v58 = vadd.f32 %v1807_v57, %v534_v55  ;;  %v614_v60 = vadd.f32 %v1809_v47, %v536_v56  ;;  %1278 = vperm.xlu0 %2101, %v1272_v41   ;;  %v1048_v34 = vld [vmem:[#allocation2 + $0xd0] sm:$0xff]  ;;  %v1047_v48 = vld [vmem:[#allocation2 + $0xc0] sm:$0xff] }
  0xac   : > { %v1050_v53 = vld [vmem:[#allocation2 + $0xf0] sm:$0xff]  ;;  %v1049_v46 = vld [vmem:[#allocation2 + $0xe0] sm:$0xff] }
  0xad   : > { %v1888_v63 = vpack.c.bf16 %v614_v60, %v612_v58  ;;  %v1270_v19 = vld [vmem:[#allocation2 + $0x140] sm:$0xff]  ;;  %v1271_v41 = vld [vmem:[#allocation2 + $0x150] sm:$0xff] }
  0xae   : > { %1293 = vperm.xlu1 %2102, %v1275_v42  }
  0xaf   : > { %1889 = vmatpush1.bf16.msra.mxu1 %v1888_v63  ;;  %1283 = vperm.xlu0 %2101, %v1273_v43   ;;  %v841_v63 = vld [vmem:[#allocation2 + $0x90] sm:$0xff] }
  0xb0   : > { %1907 = vmatprep.subr.bf16.mxu1 %v2103_v61  ;;  %v840_v61 = vld [vmem:[#allocation2 + $0x80] sm:$0xff] }
  0xb2   : > { %1832 = vmatmul.mubr.msk.f32.vlgmr.msra.gmra.mrb[0].mxu1 %vm624_vm11, %v2774_v35  ;;  %v2114_v35 = vld [vmem:[%s2612_s28 + $0x30] ss:$8 sps:$4 sm:$0xff]   ;;  %1058 = vperm.xlu1 %2102, %v1048_v34  }
  0xb3   : > { %1909 = vmatpush1.bf16.msra.mxu1 %v2105_v10  ;;  %796 = vmatprep.mubr.f32.mxu1 %v2330_v1  ;;  %v842_v10 = vld [vmem:[#allocation2 + $0xa0] sm:$0xff] }
  0xb4   : > { %1911 = vmatprep.subr.bf16.mxu1 %v2106_v11  ;;  %1053 = vperm.xlu0 %2101, %v1047_v48   ;;  %v2154_v11 = vpop.eup %2153 }
  0xb6   : > { %1833 = vmatmul.mubr.msk.f32.gmra.mrb[2].mxu1 %vm624_vm11, %v2795_v7  ;;  %v2115_v7 = vld [vmem:[%s2612_s28 + $0x44] ss:$8 sps:$4 sm:$0xff]   ;;  %1068 = vperm.xlu1 %2102, %v1050_v53  }
  0xb7   : > { %1913 = vmatpush1.bf16.msra.mxu1 %v2108_v59  ;;  %802 = vmatprep.mubr.f32.mxu1 %v2330_v1 }
  0xb8   : > { %1915 = vmatprep.subr.bf16.mxu1 %v2109_v0  ;;  %1063 = vperm.xlu0 %2101, %v1049_v46  }
  0xba   : > { %1834 = vmatmul.mubr.msk.f32.gmra.mrb[4].mxu1 %vm624_vm11, %v2815_v62  ;;  %v2118_v62 = vld [vmem:[%s2612_s28 + $0x54] ss:$8 sps:$4 sm:$0xff]  }
  0xbb   : > { %1917 = vmatpush1.bf16.msra.mxu1 %v2111_v12  ;;  %808 = vmatprep.mubr.f32.mxu1 %v2330_v1 }
  0xbc   : > { %1919 = vmatprep.subr.bf16.mxu1 %v2112_v13 }
  0xbe   : > { %1835 = vmatmul.mubr.msk.f32.gmra.mrb[6].mxu1 %vm624_vm11, %v2838_v23  ;;  %v2126_v23 = vld [vmem:[%s2612_s28 + $0x70] ss:$8 sps:$4 sm:$0xff]   ;;  %vm844_vm11 = vcmask 261120  }
  0xbf   : > { %1921 = vmatpush1.bf16.msra.mxu1 %v2114_v35  ;;  %1251 = vmatprep.mubr.f32.mxu1 %v1088_v14 }
  0xc0   : > { %1923 = vmatprep.subr.bf16.mxu1 %v2115_v7 }
  0xc3   : > { %1925 = vmatpush1.bf16.msra.mxu1 %v2117_v2 }
  0xc4   : > { %1927 = vmatprep.subr.bf16.mxu1 %v2118_v62 }
  0xc7   : > { %1929 = vmatpush1.bf16.msra.mxu1 %v2120_v5 }
  0xc8   : > { %1931 = vmatprep.subr.bf16.mxu1 %v2121_v17 }
  0xcb   : > { %1933 = vmatpush1.bf16.msra.mxu1 %v2123_v18 }
  0xcc   : > { %1935 = vmatprep.subr.bf16.mxu1 %v2124_v21 }
  0xcf   : > { %1937 = vmatpush1.bf16.msra.mxu1 %v2126_v23 }
  0xd0   : > { %1939 = vmatprep.subr.bf16.mxu1 %v2127_v24 }
  0xd3   : > { %1941 = vmatpush1.bf16.msra.mxu1 %v2129_v25 }
  0xd4   : > { %1943 = vmatprep.subr.bf16.mxu1 %v2130_v26 }
  0xd7   : > { %1945 = vmatpush1.bf16.msra.mxu1 %v2132_v27  ;;  %v836_v27 = vld [vmem:[#allocation2 + $0x40] sm:$0xff] }
  0xd8   : > { %1947 = vmatprep.subr.bf16.mxu1 %v2133_v28  ;;  %v837_v28 = vld [vmem:[#allocation2 + $0x50] sm:$0xff] }
  0xdb   : > { %1949 = vmatpush1.bf16.msra.mxu1 %v2135_v30  ;;  %v838_v30 = vld [vmem:[#allocation2 + $0x60] sm:$0xff] }
  0xdc   : > { %1951 = vmatprep.subr.bf16.mxu1 %v2136_v31  ;;  %v839_v31 = vld [vmem:[#allocation2 + $0x70] sm:$0xff] }
  0xdf   : > { %1953 = vmatpush1.bf16.msra.mxu1 %v2138_v32 }
  0xe0   : > { %1955 = vmatprep.subr.bf16.mxu1 %v2139_v33 }
  0xe3   : > { %1957 = vmatpush1.bf16.msra.mxu1 %v2141_v8 }
  0xe4   : > { %1959 = vmatprep.subr.bf16.mxu1 %v2142_v9 }
  0xe7   : > { %1961 = vmatpush1.bf16.msra.mxu1 %v2144_v15 }
  0xe8   : > { %1963 = vmatprep.subr.bf16.mxu1 %v2145_v36 }
  0xeb   : > { %1965 = vmatpush1.bf16.msra.mxu1 %v2147_v16 }
  0xec   : > { %1967 = vmatprep.subr.bf16.mxu1 %v2148_v37 }
  0xef   : > { %1969 = vmatpush1.bf16.msra.mxu1 %v2150_v38 }
  0xf2   : > { %1252 = vmatmul.mubr.f32.vlgmr.msra.gmra.mrb[8].mxu1 %v1087_v39 }
  0xf3   : > { %1257 = vmatprep.mubr.f32.mxu1 %v1090_v22  ;;  %v1268_v22 = vld [vmem:[#allocation2 + $0x120] sm:$0xff] }
  0xf6   : > { %1258 = vmatmul.mubr.f32.gmra.mrb[10].mxu1 %v1089_v40  ;;  %v1269_v40 = vld [vmem:[#allocation2 + $0x130] sm:$0xff] }
 0x129   : > { %v1289_v42 = vpop.permute.xlu1 %1288 }
 0x12a   : > { %v1279_v29 = vpop.permute.xlu0 %1278 }
 0x12e   : > { %v1284_v43 = vpop.permute.xlu0 %1283 }
 0x164   : > { %v703_v44 = vpop.f32.mrb[0].mxu0 }
 0x165   : > { %v705_v6 = vpop.f32.mrb[1].mxu0 }
 0x168   : > { %v709_v51 = vpop.f32.mrb[2].mxu0 }
 0x169   : > { %v1892_v20 = vpack.c.bf16 %v709_v51, %v703_v44  ;;  %v711_v52 = vpop.f32.mrb[3].mxu0  ;;  %v1294_v44 = vpop.permute.xlu1 %1293 }
 0x16a   : > { %v1890_v54 = vpack.c.bf16 %v711_v52, %v705_v6  ;;  %v1054_v6 = vpop.permute.xlu0 %1053 }
 0x16c   : > { %v715_v55 = vpop.f32.mrb[4].mxu0  ;;  %1891 = vmatprep.subr.bf16.mxu0 %v1890_v54 }
 0x16d   : > { %v717_v56 = vpop.f32.mrb[5].mxu0  ;;  %1893 = vmatpush1.bf16.msra.mxu0 %v1892_v20  ;;  %v1059_v20 = vpop.permute.xlu1 %1058 }
 0x170   : > { %v721_v57 = vpop.f32.mrb[6].mxu0 }
 0x171   : > { %v1896_v47 = vpack.c.bf16 %v721_v57, %v715_v55  ;;  %v723_v58 = vpop.f32.mrb[7].mxu0 }
 0x172   : > { %v1894_v60 = vpack.c.bf16 %v723_v58, %v717_v56 }
 0x174   : > { %1895 = vmatprep.subr.bf16.mxu0 %v1894_v60 }
 0x175   : > { %1897 = vmatpush1.bf16.msra.mxu0 %v1896_v47  ;;  %v1064_v47 = vpop.permute.xlu0 %1063 }
 0x178   : > { %1836 = vmatmul.mubr.msk.f32.vlgmr.msra.gmra.mrb[8].mxu0 %vm844_vm11, %v840_v61 }
 0x179   : > { %927 = vmatprep.mubr.f32.mxu0 %v2330_v1 }
 0x17c   : > { %1837 = vmatmul.mubr.msk.f32.gmra.mrb[10].mxu0 %vm844_vm11, %v841_v63 }
 0x17d   : > { %933 = vmatprep.mubr.f32.mxu0 %v2330_v1 }
 0x180   : > { %1838 = vmatmul.mubr.msk.f32.gmra.mrb[12].mxu0 %vm844_vm11, %v842_v10 }
 0x181   : > { %939 = vmatprep.mubr.f32.mxu0 %v2330_v1 }
 0x184   : > { %1839 = vmatmul.mubr.msk.f32.gmra.mrb[14].mxu0 %vm844_vm11, %v843_v4 }
 0x185   : > { %v792_v59 = vpop.f32.mrb[0].mxu1  ;;  %1022 = vmatprep.mubr.f32.mxu0 %v2330_v1 }
 0x186   : > { %v827_v3 = vmul.f32 %v2152_v49, %v792_v59  ;;  %v794_v45 = vpop.f32.mrb[1].mxu1 }
 0x187   : > { %v829_v50 = vmul.f32 %v2154_v11, %v794_v45 }
 0x189   : > { %v798_v0 = vpop.f32.mrb[2].mxu1 }
 0x18a   : > { %v830_v12 = vmul.f32 %v2152_v49, %v798_v0  ;;  %v800_v13 = vpop.f32.mrb[3].mxu1 }
 0x18b   : > { %v831_v35 = vmul.f32 %v2154_v11, %v800_v13 }
 0x18c   : > { %v1900_v7 = vpack.c.bf16 %v830_v12, %v827_v3 }
 0x18d   : > { %v1898_v14 = vpack.c.bf16 %v831_v35, %v829_v50  ;;  %v804_v2 = vpop.f32.mrb[4].mxu1 }
 0x18e   : > { %v832_v62 = vmul.f32 %v2152_v49, %v804_v2  ;;  %v806_v5 = vpop.f32.mrb[5].mxu1 }
 0x18f   : > { %1899 = vmatprep.subr.bf16.mxu0 %v1898_v14  ;;  %v833_v17 = vmul.f32 %v2154_v11, %v806_v5 }
 0x190   : > { %1901 = vmatpush1.bf16.msra.mxu0 %v1900_v7 }
 0x191   : > { %v810_v18 = vpop.f32.mrb[6].mxu1 }
 0x192   : > { %v834_v21 = vmul.f32 %v2152_v49, %v810_v18  ;;  %v812_v23 = vpop.f32.mrb[7].mxu1 }
 0x193   : > { %v835_v24 = vmul.f32 %v2154_v11, %v812_v23  ;;  %v1069_v11 = vpop.permute.xlu1 %1068 }
 0x194   : > { %v1904_v25 = vpack.c.bf16 %v834_v21, %v832_v62 }
 0x195   : > { %v1902_v26 = vpack.c.bf16 %v835_v24, %v833_v17 }
 0x197   : > { %1903 = vmatprep.subr.bf16.mxu0 %v1902_v26 }
 0x198   : > { %1905 = vmatpush1.bf16.msra.mxu0 %v1904_v25 }
 0x19b   : > { %1840 = vmatmul.mubr.msk.f32.vlgmr.msra.gmra.mrb[8].mxu0 %vm844_vm11, %v836_v27 }
 0x19c   : > { %1028 = vmatprep.mubr.f32.mxu0 %v2330_v1 }
 0x19f   : > { %1841 = vmatmul.mubr.msk.f32.gmra.mrb[10].mxu0 %vm844_vm11, %v837_v28 }
 0x1a0   : > { %1034 = vmatprep.mubr.f32.mxu0 %v2330_v1 }
 0x1a3   : > { %1842 = vmatmul.mubr.msk.f32.gmra.mrb[12].mxu0 %vm844_vm11, %v838_v30 }
 0x1a4   : > { %1040 = vmatprep.mubr.f32.mxu0 %v2330_v1 }
 0x1a7   : > { %1843 = vmatmul.mubr.msk.f32.gmra.mrb[14].mxu0 %vm844_vm11, %v839_v31 }
 0x1a8   : > { %1373 = vmatprep.mubr.f32.mxu0 %v2330_v1 }
 0x1c5   : > { %v1253_v32 = vpop.f32.mrb[8].mxu1 }
 0x1c6   : > { %v1255_v33 = vpop.f32.mrb[9].mxu1  ;;  %v1264_v9 = vmax.f32 %v1253_v32, 0.0 }
 0x1c7   : > { %v1265_v16 = vmax.f32 %v1255_v33, 0.0 }
 0x1c9   : > { %v1259_v8 = vpop.f32.mrb[10].mxu1 }
 0x1ca   : > { %v1266_v15 = vmax.f32 %v1259_v8, 0.0  ;;  %v1261_v36 = vpop.f32.mrb[11].mxu1 }
 0x1cb   : > { %v1267_v37 = vmax.f32 %v1261_v36, 0.0 }
 0x1cc   : > { %v1972_v38 = vpack.c.bf16 %v1266_v15, %v1264_v9 }
 0x1cd   : > { %v1970_v39 = vpack.c.bf16 %v1267_v37, %v1265_v16 }
 0x1cf   : > { %1971 = vmatprep.subr.bf16.mxu0 %v1970_v39 }
 0x1d0   : > { %1973 = vmatpush1.bf16.msra.mxu0 %v1972_v38 }
 0x1d3   : > { %1844 = vmatmul.mubr.msk.f32.vlgmr.msra.gmra.mrb[16].mxu0 %vm1296_vm0, %v1268_v22 }
 0x1d4   : > { %1379 = vmatprep.mubr.f32.mxu0 %v2330_v1 }
 0x1d7   : > { %1845 = vmatmul.mubr.msk.f32.gmra.mrb[18].mxu0 %vm1296_vm0, %v1269_v40 }
 0x1d8   : > { %1385 = vmatprep.mubr.f32.mxu0 %v2330_v1 }
 0x1db   : > { %1846 = vmatmul.mubr.msk.f32.gmra.mrb[20].mxu0 %vm1296_vm0, %v1270_v19 }
 0x1dc   : > { %1391 = vmatprep.mubr.f32.mxu0 %v2330_v1 }
 0x1df   : > { %1847 = vmatmul.mubr.msk.f32.gmra.mrb[22].mxu0 %vm1296_vm0, %v1271_v41 }
 0x1e0   : > { %1475 = vmatprep.mubr.f32.mxu0 %v2330_v1 }
 0x26e   : > { %v1024_v34 = vpop.f32.mrb[8].mxu0 }
 0x26f   : > { %v1026_v48 = vpop.f32.mrb[9].mxu0  ;;  %v1071_v51 = vadd.f32 %v1054_v6, %v1024_v34 }
 0x270   : > { %v1072_v52 = vadd.f32 %v1054_v6, %v1026_v48 }
 0x271   : > { %v1079_v46 = vmax.f32 %v1071_v51, 0.0 }
 0x272   : > { %v1030_v53 = vpop.f32.mrb[10].mxu0  ;;  %v1080_v56 = vmax.f32 %v1072_v52, 0.0 }
 0x273   : > { %v1073_v54 = vadd.f32 %v1059_v20, %v1030_v53  ;;  %v1032_v55 = vpop.f32.mrb[11].mxu0 }
 0x274   : > { %v1074_v57 = vadd.f32 %v1059_v20, %v1032_v55 }
 0x275   : > { %v1081_v58 = vmax.f32 %v1073_v54, 0.0 }
 0x276   : > { %v1082_v60 = vmax.f32 %v1074_v57, 0.0  ;;  %v1036_v61 = vpop.f32.mrb[12].mxu0 }
 0x277   : > { %v1984_v63 = vpack.c.bf16 %v1081_v58, %v1079_v46  ;;  %v1038_v10 = vpop.f32.mrb[13].mxu0  ;;  %v1075_v4 = vadd.f32 %v1064_v47, %v1036_v61 }
 0x278   : > { %v1982_v49 = vpack.c.bf16 %v1082_v60, %v1080_v56  ;;  %v1076_v59 = vadd.f32 %v1064_v47, %v1038_v10 }
 0x279   : > { %v1083_v50 = vmax.f32 %v1075_v4, 0.0 }
 0x27a   : > { %v1042_v3 = vpop.f32.mrb[14].mxu0  ;;  %v1084_v12 = vmax.f32 %v1076_v59, 0.0 }
 0x27b   : > { %v1077_v45 = vadd.f32 %v1069_v11, %v1042_v3  ;;  %v1044_v0 = vpop.f32.mrb[15].mxu0 }
 0x27c   : > { %v1078_v13 = vadd.f32 %v1069_v11, %v1044_v0 }
 0x27d   : > { %v1085_v35 = vmax.f32 %v1077_v45, 0.0 }
 0x27e   : > { %v1086_v7 = vmax.f32 %v1078_v13, 0.0 }
 0x27f   : > { %v1988_v14 = vpack.c.bf16 %v1085_v35, %v1083_v50 }
 0x280   : > { %v1986_v2 = vpack.c.bf16 %v1086_v7, %v1084_v12 }
 0x2a6   : > { %v1375_v62 = vpop.f32.mrb[16].mxu0 }
 0x2a7   : > { %v1377_v5 = vpop.f32.mrb[17].mxu0  ;;  %v1376_v17 = vadd.f32 %v1375_v62, %v1279_v29 }
 0x2a8   : > { %v1378_v18 = vadd.f32 %v1377_v5, %v1279_v29 }
 0x2a9   : > { %v1398_v26 = vmax.f32 %v1376_v17, 0.0 }
 0x2aa   : > { %v1381_v21 = vpop.f32.mrb[18].mxu0  ;;  %v1399_v28 = vmax.f32 %v1378_v18, 0.0 }
 0x2ab   : > { %v1382_v23 = vadd.f32 %v1381_v21, %v1284_v43  ;;  %v1383_v24 = vpop.f32.mrb[19].mxu0 }
 0x2ac   : > { %v1384_v25 = vadd.f32 %v1383_v24, %v1284_v43  ;;  %v1407_v43 = vld [vmem:[#allocation2 + $0x1b0] sm:$0xff] }
 0x2ad   : > { %v1400_v27 = vmax.f32 %v1382_v23, 0.0 }
 0x2ae   : > { %v1401_v30 = vmax.f32 %v1384_v25, 0.0  ;;  %v1387_v31 = vpop.f32.mrb[20].mxu0 }
 0x2af   : > { %v1976_v32 = vpack.c.bf16 %v1400_v27, %v1398_v26  ;;  %v1389_v33 = vpop.f32.mrb[21].mxu0  ;;  %v1388_v9 = vadd.f32 %v1387_v31, %v1289_v42 }
 0x2b0   : > { %v1974_v8 = vpack.c.bf16 %v1401_v30, %v1399_v28  ;;  %v1390_v15 = vadd.f32 %v1389_v33, %v1289_v42  ;;  %v1406_v42 = vld [vmem:[#allocation2 + $0x1a0] sm:$0xff] }
 0x2b1   : > { %v1402_v39 = vmax.f32 %v1388_v9, 0.0 }
 0x2b2   : > { %v1393_v36 = vpop.f32.mrb[22].mxu0  ;;  %1975 = vmatprep.subr.bf16.mxu0 %v1974_v8  ;;  %v1403_v40 = vmax.f32 %v1390_v15, 0.0 }
 0x2b3   : > { %v1394_v16 = vadd.f32 %v1393_v36, %v1294_v44  ;;  %v1395_v37 = vpop.f32.mrb[23].mxu0  ;;  %1977 = vmatpush1.bf16.msra.mxu0 %v1976_v32 }
 0x2b4   : > { %v1396_v38 = vadd.f32 %v1395_v37, %v1294_v44 }
 0x2b5   : > { %v1404_v22 = vmax.f32 %v1394_v16, 0.0 }
 0x2b6   : > { %v1405_v19 = vmax.f32 %v1396_v38, 0.0 }
 0x2b7   : > { %v1980_v41 = vpack.c.bf16 %v1404_v22, %v1402_v39 }
 0x2b8   : > { %v1978_v29 = vpack.c.bf16 %v1405_v19, %v1403_v40 }
 0x2ba   : > { %1979 = vmatprep.subr.bf16.mxu0 %v1978_v29 }
 0x2bb   : > { %1981 = vmatpush1.bf16.msra.mxu0 %v1980_v41 }
 0x2bc   : > { %1983 = vmatprep.subr.bf16.mxu0 %v1982_v49 }
 0x2be   : > { %1848 = vmatmul.mubr.msk.f32.vlgmr.msra.gmra.mrb[24].mxu0 %vm844_vm11, %v1407_v43 }
 0x2bf   : > { %1985 = vmatpush1.bf16.msra.mxu0 %v1984_v63  ;;  %1549 = vmatprep.mubr.f32.mxu0 %v2330_v1 }
 0x2c0   : > { %1987 = vmatprep.subr.bf16.mxu0 %v1986_v2 }
 0x2c3   : > { %1989 = vmatpush1.bf16.msra.mxu0 %v1988_v14 }
 0x2c6   : > { %1849 = vmatmul.mubr.msk.f32.vlgmr.msra.gmra.mrb[24].mxu0 %vm844_vm11, %v1406_v42 }
 0x399   : > { %v1551_v44 = vpop.f32.mrb[24].mxu0 }
 0x39a   : > { %v1556_v6 = vrot.slane %v1551_v44, 4  ;;  %v1553_v34 = vpop.f32.mrb[25].mxu0 }
 0x39b   : > { %v1562_v48 = vrot.slane %v1553_v34, 4 }
 0x39c   : > { %v1557_v51 = vmax.f32 %v1551_v44, %v1556_v6 }
 0x39d   : > { %v1563_v20 = vmax.f32 %v1553_v34, %v1562_v48 }
 0x39e   : > { %v1558_v52 = vrot.slane %v1557_v51, 2 }
 0x39f   : > { %v1564_v53 = vrot.slane %v1563_v20, 2 }
 0x3a0   : > { %v1559_v54 = vmax.f32 %v1557_v51, %v1558_v52 }
 0x3a1   : > { %v1565_v46 = vmax.f32 %v1563_v20, %v1564_v53 }
 0x3a2   : > { %v1560_v55 = vrot.slane %v1559_v54, 1 }
 0x3a3   : > { %v1566_v56 = vrot.slane %v1565_v46, 1 }
 0x3a4   : > { %v1561_v57 = vmax.f32 %v1559_v54, %v1560_v55 }
 0x3a5   : > { %v1567_v47 = vmax.f32 %v1565_v46, %v1566_v56 }
 0x3a6   : > { %v1568_v1 = vsub.f32 %v1551_v44, %v1561_v57 }
 0x3a7   : > { %v1569_v58 = vsub.f32 %v1553_v34, %v1567_v47 }
 0x3a8   : > { %v1570_v60 = vmul.f32 1.442695, %v1568_v1 }
 0x3a9   : > { %v1572_v61 = vmul.f32 1.442695, %v1569_v58 }
 0x3aa   : > { %2155 = vpow2.f32 %v1570_v60 }
 0x3ab   : > { %2157 = vpow2.f32 %v1572_v61 }
 0x3b4   : > { %v2156_v63 = vpop.eup %2155 }
 0x3b5   : > { %v2158_v10 = vpop.eup %2157  ;;  %v1574_v4 = vrot.slane %v2156_v63, 4 }
 0x3b6   : > { %v1580_v49 = vrot.slane %v2158_v10, 4 }
 0x3b7   : > { %v1575_v11 = vadd.f32 %v2156_v63, %v1574_v4 }
 0x3b8   : > { %v1581_v59 = vadd.f32 %v2158_v10, %v1580_v49 }
 0x3b9   : > { %v1576_v3 = vrot.slane %v1575_v11, 2 }
 0x3ba   : > { %v1582_v45 = vrot.slane %v1581_v59, 2 }
 0x3bb   : > { %v1577_v50 = vadd.f32 %v1576_v3, %v1575_v11 }
 0x3bc   : > { %v1583_v0 = vadd.f32 %v1582_v45, %v1581_v59 }
 0x3bd   : > { %v1578_v12 = vrot.slane %v1577_v50, 1 }
 0x3be   : > { %v1584_v13 = vrot.slane %v1583_v0, 1 }
 0x3bf   : > { %v1579_v35 = vadd.f32 %v1578_v12, %v1577_v50 }
 0x3c0   : > { %v1585_v7 = vadd.f32 %v1584_v13, %v1583_v0 }
 0x3c1   : > { %2159 = vrcp.f32 %v1579_v35 }
 0x3c2   : > { %2161 = vrcp.f32 %v1585_v7 }
 0x3cb   : > { %v2160_v14 = vpop.eup %2159 }
 0x3cc   : > { %v2162_v2 = vpop.eup %2161  ;;  %v1588_v62 = vmul.f32 %v2160_v14, %v2156_v63 }
 0x3cd   : > { %v1589_v5 = vmul.f32 %v2162_v2, %v2158_v10 }
 0x3ce   : > { %1590 = vst [vmem:[%s238_s21] sm:$0xff] %v1588_v62 }
 0x3cf   : > { %1591 = vst [vmem:[%s238_s21 + $0x8] sm:$0xff] %v1589_v5 }
 0x3d0   : > { %2264 = shalt.err (!%p2261_p5)
}
 0x3d1   : > { %s2265_s9 = scalar_lea.hbm %s2977_s30, 256  ;;  %s2269_s10 = scalar_lea.hbm %s3024_s3, 512 }
 0x3d2   : > { %p2266_p11 = scmp.ne.s32.totalorder %s2977_s30, %s2265_s9  ;;  %p2270_p10 = scmp.lt.u32.totalorder %s2977_s30, %s3024_s3 }
 0x3d3   : > { %p2271_p4 = scmp.lt.u32.totalorder %s2269_s10, %s2265_s9  ;;  %p2273_p7 = scmp.lt.u32.totalorder %s2265_s9, %s2977_s30 }
 0x3d4   : > { %p2267_p9 = pnand %p2266_p11, %p3039_p12 }
 0x3d5   : > { %p2272_p0 = por %p2271_p4, %p2270_p10 }
 0x3d6   : > { %p2268_p8 = pneg %p2267_p9 }
 0x3d7   : > { %p2274_p2 = por %p2273_p7, %p2272_p0 }
 0x3d9   : > { %p2275_p6 = pnand %p2274_p2, %p2268_p8 }
 0x3db   : > { %2278 = shalt.err (!%p2275_p6)
}
 0x3dc   : > { %2040 = dma.vmem_to_hbm [thread:$0]  (%p3039_p12), %s2979_s24, 256, %s2977_s30, %s1593_s23  }
 0x3dd PF: > { %s1619_s25 = sand.u32 1, %s2309_s12   ;;  %p3040_p13 = scmp.ne.s32.totalorder %s3032_s27, 0 }
 0x3de   : > { %p3041_p3 = scmp.ge.s32.totalorder %s2321_s15, 2  ;;  %s1620_s28 = scalar_lea.sflag [#allocation4], %s1619_s25 }
 0x3e0   : > { %p2054_p1 = pnand %p3041_p3, %p3040_p13 }
 0x3e2   : > { %2304 = dma.done.wait (!%p2054_p1), %s1620_s28, 256  }
 0x3e3   : > { %2306 = vsyncadd (!%p2054_p1), %s1620_s28, 4294967040  ;;  %p17_p5 = scmp.ge.s32.totalorder %s2375_s16, 4   ;;  %s3042_s12 = smov %s2313_s13 }
 0x3e4   : > { %s3043_s13 = smov %s2317_s14  ;;  %s3044_s14 = smov %s2386_s19 }
 0x3e5   : > { %s3045_s15 = smov %s2375_s16  ;;  %19 = sbr.rel (!%p17_p5) target bundleno = 6 (0x6), region = 97 }
 0x3ec   :  { %1625 = vsyncpa [#allocation3], 1 }
 0x3ed   :  { %1627 = vsyncpa [#allocation3 + $0x1], 1 }
 0x3ee   :  { %1628 = vsyncpa [#allocation6], 1 }
 0x3ef   :  { %1630 = vsyncpa [#allocation6 + $0x1], 1 }
 0x3f0   :  { %1631 = vsyncpa [#allocation4], 1 }
 0x3f1   :  { %1633 = vsyncpa [#allocation4 + $0x1], 1 }

</bundles_post_ra>
